<compile_context>
chip_gen: v5e
topology: v5e:2x2
jax: 0.10.0
libtpu: 0.0.40
codegen_flags: <defaults>
</compile_context>

<pallas_src>
import functools

import numpy as np
import jax
import jax.numpy as jnp
from jax.experimental import pallas as pl
from jax.experimental.pallas import tpu as pltpu


_SELU_ALPHA = 1.6732632423543772848170429916717
_SELU_SCALE = 1.0507009873554804934193349852946


# ----------------------------------------------------------------------------
# Fused decoder-MLP kernel:  out = (SELU(x @ W1 + b1)) @ W2 + b2
# ----------------------------------------------------------------------------
def _decoder_kernel(x_ref, w1_ref, b1_ref, w2_ref, b2_ref, o_ref):
    # x_ref : (TM, E) f32   w1_ref: (E, H) bf16   b1_ref: (1, H) f32
    # w2_ref: (H, O) bf16   b2_ref: (1, O) f32    o_ref : (TM, O) f32
    x = x_ref[...].astype(jnp.bfloat16)                      # bf16 MXU operand
    h = jnp.dot(x, w1_ref[...], preferred_element_type=jnp.float32) + b1_ref[...]
    # SELU in f32 (exp goes to the EUP slot; evaluated once per element)
    neg = _SELU_ALPHA * (jnp.exp(jnp.minimum(h, 0.0)) - 1.0)
    h = _SELU_SCALE * jnp.where(h > 0.0, h, neg)
    h = h.astype(jnp.bfloat16)                               # bf16 MXU operand
    o = jnp.dot(h, w2_ref[...], preferred_element_type=jnp.float32) + b2_ref[...]
    o_ref[...] = o.astype(o_ref.dtype)


def _choose_tile_m(M):
    # Largest tile in {512, 256, 128} that still leaves >= 2 grid steps
    # (v7x megacore sharding); bigger tiles fill the 256-wide MXU (v6e/v7x)
    # and amortize per-step overhead on all generations.
    for t in (512, 256, 128):
        if M >= 2 * t:
            return t
    return 128


def decoder_mlp(x2d, w1, b1, w2, b2):
    # x2d: (M, E) with M = B*T*num_patches (flattened batch dims)
    M, E = x2d.shape
    H = w1.shape[1]
    O = w2.shape[1]

    tile_m = _choose_tile_m(M)
    grid_m = pl.cdiv(M, tile_m)          # no padding / slicing; Pallas masks
                                         # the partial last block

    # Pre-cast weights to bf16: halves weight DMA + VMEM, feeds the MXU its
    # native dtype.  Biases stay f32 (added after the f32 accumulation).
    w1b = w1.astype(jnp.bfloat16)
    w2b = w2.astype(jnp.bfloat16)

    bytes_accessed = (
        x2d.size * x2d.dtype.itemsize
        + w1b.size * 2 + w2b.size * 2
        + b1.size * 4 + b2.size * 4
        + M * O * x2d.dtype.itemsize)
    cost = pl.CostEstimate(
        flops=2 * M * (E * H + H * O),
        transcendentals=M * H,            # one exp per hidden element
        bytes_accessed=bytes_accessed)

    return pl.pallas_call(
        _decoder_kernel,
        out_shape=jax.ShapeDtypeStruct((M, O), x2d.dtype),
        grid=(grid_m,),
        in_specs=[
            pl.BlockSpec((tile_m, E), lambda i: (i, 0)),
            # Constant index_maps: weights/biases stay VMEM-resident across
            # grid steps (no re-DMA).
            pl.BlockSpec((E, H), lambda i: (0, 0)),
            pl.BlockSpec((1, H), lambda i: (0, 0)),
            pl.BlockSpec((H, O), lambda i: (0, 0)),
            pl.BlockSpec((1, O), lambda i: (0, 0)),
        ],
        out_specs=pl.BlockSpec((tile_m, O), lambda i: (i, 0)),
        compiler_params=pltpu.CompilerParams(
            dimension_semantics=("parallel",),
            vmem_limit_bytes=32 * 1024 * 1024),
        cost_estimate=cost,
    )(x2d, w1b, b1, w2b, b2)


# ----------------------------------------------------------------------------
# PatchDecoding forward (matches the PyTorch module's forward semantics)
# ----------------------------------------------------------------------------
def patch_decoding_forward(params, x, original_shape, *, patch_size,
                           embedding_dim):
    # x: (B, T, N) with N = num_patches * embedding_dim
    # original_shape: (C, X, Y, Z)
    B, T, N = x.shape
    C, X, Y, Z = original_shape
    P = N // embedding_dim
    ps = patch_size
    w1, b1, w2, b2 = params

    x2d = x.reshape(B * T * P, embedding_dim)
    dec = decoder_mlp(x2d, w1, b1, w2, b2)               # (B*T*P, C*ps^3)

    # view -> permute(0,3,1,4,2,5,6) -> contiguous -> view, exactly as in torch.
    # (T-minor output layout is fixed by the module contract; see TODO above.)
    dec = dec.reshape(B, T, P, C, ps, ps, ps)
    patches = jnp.transpose(dec, (0, 3, 1, 4, 2, 5, 6))  # (B, C, T, ps, P, ps, ps)
    return patches.reshape(B, C, X, Y, Z, T)


# ----------------------------------------------------------------------------
# Parameter init (deterministic, PyTorch nn.Linear-like uniform bounds).
# Weights stored (in, out) so the kernel does x @ W directly.
# ----------------------------------------------------------------------------
def init_params(key, embedding_dim, out_channels, patch_size):
    hid = 2 * out_channels * patch_size ** 3
    out = out_channels * patch_size ** 3
    k1, k2, k3, k4 = jax.random.split(key, 4)
    bd1 = 1.0 / np.sqrt(embedding_dim)
    w1 = jax.random.uniform(k1, (embedding_dim, hid), jnp.float32, -bd1, bd1)
    b1 = jax.random.uniform(k2, (1, hid), jnp.float32, -bd1, bd1)
    bd2 = 1.0 / np.sqrt(hid)
    w2 = jax.random.uniform(k3, (hid, out), jnp.float32, -bd2, bd2)
    b2 = jax.random.uniform(k4, (1, out), jnp.float32, -bd2, bd2)
    return (w1, b1, w2, b2)


# ----------------------------------------------------------------------------
# Pure-JAX f32 reference (true module semantics) for correctness check.
# ----------------------------------------------------------------------------
def patch_decoding_ref(params, x, original_shape, *, patch_size, embedding_dim):
    B, T, N = x.shape
    C, X, Y, Z = original_shape
    ps = patch_size
    w1, b1, w2, b2 = params
    xr = x.reshape(B, T, -1, embedding_dim)
    h = jax.nn.selu(
        jnp.dot(xr, w1, preferred_element_type=jnp.float32) + b1[0])
    dec = jnp.dot(h, w2, preferred_element_type=jnp.float32) + b2[0]
    dec = dec.reshape(B, T, -1, C, ps, ps, ps)
    patches = jnp.transpose(dec, (0, 3, 1, 4, 2, 5, 6))
    return patches.reshape(B, C, X, Y, Z, T)


# ----------------------------------------------------------------------------
if __name__ == "__main__":
    key = jax.random.PRNGKey(0)

    # Small, module-consistent shapes:
    #   embedding_dim=128, out_channels=4, patch_size=4
    #   -> hidden = 2*C*ps^3 = 512, decoded patch = C*ps^3 = 256
    #   B=2, T=16, num_patches P=8  -> x: (2, 16, 8*128) = (2, 16, 1024)
    #   original_shape = (C, X, Y, Z) = (4, 8, 8, 8)
    B, T = 2, 16
    EMB, C, PS = 128, 4, 4
    P = 8
    original_shape = (C, 8, 8, 8)

    kp, kx = jax.random.split(key)
    params = init_params(kp, EMB, C, PS)
    x = jax.random.normal(kx, (B, T, P * EMB), jnp.float32)

    fwd = functools.partial(patch_decoding_forward, patch_size=PS,
                            embedding_dim=EMB)
    out = jax.block_until_ready(
        jax.jit(fwd, static_argnames=("original_shape",))(params, x,
                                                          original_shape))
    ref = jax.block_until_ready(
        patch_decoding_ref(params, x, original_shape, patch_size=PS,
                           embedding_dim=EMB))

    assert out.shape == (B, C, 8, 8, 8, T), out.shape
    # Tolerance relaxed vs the f32 reference because the kernel feeds the MXU
    # bf16 operands (f32 accumulation); typical abs error here is ~3e-3.
    np.testing.assert_allclose(np.asarray(out), np.asarray(ref),
                               rtol=3e-2, atol=3e-2)
    print("KERNEL_OK")
</pallas_src>

<mosaic_0001>
module attributes {stable_mosaic.version = 11 : i64} {
  func.func @_decoder_kernel(%arg0: i32, %arg1: memref<128x128xf32, #tpu.memory_space<vmem>>, %arg2: memref<128x512xbf16, #tpu.memory_space<vmem>>, %arg3: memref<1x512xf32, #tpu.memory_space<vmem>>, %arg4: memref<512x256xbf16, #tpu.memory_space<vmem>>, %arg5: memref<1x256xf32, #tpu.memory_space<vmem>>, %arg6: memref<128x256xf32, #tpu.memory_space<vmem>>) attributes {dimension_semantics = [#tpu.dimension_semantics<parallel>], iteration_bounds = array<i64: 2>, scalar_prefetch = 0 : i64, scratch_operands = 0 : i64, tpu.core_type = #tpu.core_type<tc>, window_params = [{transform_indices = @transform_0, window_bounds = array<i64: 128, 128>}, {pipeline_mode = #tpu.pipeline_mode<synchronous>, transform_indices = @transform_1, window_bounds = array<i64: 128, 512>}, {pipeline_mode = #tpu.pipeline_mode<synchronous>, transform_indices = @transform_2, window_bounds = array<i64: 1, 512>}, {pipeline_mode = #tpu.pipeline_mode<synchronous>, transform_indices = @transform_3, window_bounds = array<i64: 512, 256>}, {pipeline_mode = #tpu.pipeline_mode<synchronous>, transform_indices = @transform_4, window_bounds = array<i64: 1, 256>}, {transform_indices = @transform_5, window_bounds = array<i64: 128, 256>}]} {
    %c0 = arith.constant 0 : index
    %c0_0 = arith.constant 0 : index
    %0 = vector.load %arg1[%c0, %c0_0] : memref<128x128xf32, #tpu.memory_space<vmem>>, vector<128x128xf32>
    %1 = arith.truncf %0 : vector<128x128xf32> to vector<128x128xbf16>
    %c0_1 = arith.constant 0 : index
    %c0_2 = arith.constant 0 : index
    %2 = vector.load %arg2[%c0_1, %c0_2] : memref<128x512xbf16, #tpu.memory_space<vmem>>, vector<128x512xbf16>
    %cst = arith.constant dense<0.000000e+00> : vector<128x512xf32>
    %3 = tpu.matmul %1, %2, %cst {dimension_numbers = #tpu.dot_dimension_numbers<[1], [0], [0], [1], [0, 0, 1, 1], [], []>} : vector<128x128xbf16>, vector<128x512xbf16>, vector<128x512xf32> -> vector<128x512xf32>
    %c0_3 = arith.constant 0 : index
    %c0_4 = arith.constant 0 : index
    %4 = vector.load %arg3[%c0_3, %c0_4] : memref<1x512xf32, #tpu.memory_space<vmem>>, vector<1x512xf32>
    %5 = vector.broadcast %4 : vector<1x512xf32> to vector<128x512xf32>
    %6 = arith.addf %3, %5 : vector<128x512xf32>
    %cst_5 = arith.constant 0.000000e+00 : f32
    %7 = vector.broadcast %cst_5 : f32 to vector<128x512xf32>
    %8 = arith.minimumf %6, %7 : vector<128x512xf32>
    %9 = math.exp %8 : vector<128x512xf32>
    %cst_6 = arith.constant 1.000000e+00 : f32
    %10 = vector.broadcast %cst_6 : f32 to vector<128x512xf32>
    %11 = arith.subf %9, %10 : vector<128x512xf32>
    %cst_7 = arith.constant 1.67326319 : f32
    %12 = vector.broadcast %cst_7 : f32 to vector<128x512xf32>
    %13 = arith.mulf %12, %11 : vector<128x512xf32>
    %cst_8 = arith.constant 0.000000e+00 : f32
    %14 = vector.broadcast %cst_8 : f32 to vector<128x512xf32>
    %15 = arith.cmpf ogt, %6, %14 : vector<128x512xf32>
    %16 = arith.select %15, %6, %13 : vector<128x512xi1>, vector<128x512xf32>
    %cst_9 = arith.constant 1.05070102 : f32
    %17 = vector.broadcast %cst_9 : f32 to vector<128x512xf32>
    %18 = arith.mulf %17, %16 : vector<128x512xf32>
    %19 = arith.truncf %18 : vector<128x512xf32> to vector<128x512xbf16>
    %c0_10 = arith.constant 0 : index
    %c0_11 = arith.constant 0 : index
    %20 = vector.load %arg4[%c0_10, %c0_11] : memref<512x256xbf16, #tpu.memory_space<vmem>>, vector<512x256xbf16>
    %cst_12 = arith.constant dense<0.000000e+00> : vector<128x256xf32>
    %21 = tpu.matmul %19, %20, %cst_12 {dimension_numbers = #tpu.dot_dimension_numbers<[1], [0], [0], [1], [0, 0, 1, 1], [], []>} : vector<128x512xbf16>, vector<512x256xbf16>, vector<128x256xf32> -> vector<128x256xf32>
    %c0_13 = arith.constant 0 : index
    %c0_14 = arith.constant 0 : index
    %22 = vector.load %arg5[%c0_13, %c0_14] : memref<1x256xf32, #tpu.memory_space<vmem>>, vector<1x256xf32>
    %23 = vector.broadcast %22 : vector<1x256xf32> to vector<128x256xf32>
    %24 = arith.addf %21, %23 : vector<128x256xf32>
    %c0_15 = arith.constant 0 : index
    %c0_16 = arith.constant 0 : index
    %25 = vector.load %arg6[%c0_15, %c0_16] : memref<128x256xf32, #tpu.memory_space<vmem>>, vector<128x256xf32>
    tpu.vector_store %arg6[%c0_15, %c0_16], %24 {strides = array<i32>} : memref<128x256xf32, #tpu.memory_space<vmem>>, vector<128x256xf32>,
    return
  }
  func.func @transform_0(%arg0: i32) -> (i32, i32) {
    %c0_i32 = arith.constant 0 : i32
    %c0_i32_0 = arith.constant 0 : i32
    return %arg0, %c0_i32 : i32, i32
  }
  func.func @transform_1(%arg0: i32) -> (i32, i32) {
    %c0_i32 = arith.constant 0 : i32
    %c0_i32_0 = arith.constant 0 : i32
    %c0_i32_1 = arith.constant 0 : i32
    return %c0_i32, %c0_i32_0 : i32, i32
  }
  func.func @transform_2(%arg0: i32) -> (i32, i32) {
    %c0_i32 = arith.constant 0 : i32
    %c0_i32_0 = arith.constant 0 : i32
    %c0_i32_1 = arith.constant 0 : i32
    return %c0_i32, %c0_i32_0 : i32, i32
  }
  func.func @transform_3(%arg0: i32) -> (i32, i32) {
    %c0_i32 = arith.constant 0 : i32
    %c0_i32_0 = arith.constant 0 : i32
    %c0_i32_1 = arith.constant 0 : i32
    return %c0_i32, %c0_i32_0 : i32, i32
  }
  func.func @transform_4(%arg0: i32) -> (i32, i32) {
    %c0_i32 = arith.constant 0 : i32
    %c0_i32_0 = arith.constant 0 : i32
    %c0_i32_1 = arith.constant 0 : i32
    return %c0_i32, %c0_i32_0 : i32, i32
  }
  func.func @transform_5(%arg0: i32) -> (i32, i32) {
    %c0_i32 = arith.constant 0 : i32
    %c0_i32_0 = arith.constant 0 : i32
    return %arg0, %c0_i32 : i32, i32
  }
}

</mosaic_0001>

<bundles_post_ra>
// kernel: patch_decoding_forward.1
= control target key start
LH: loop header
LB: loop body
LE: loop exit
PB: predicated region body
PF: predicated region fallthrough
CT: control target
= control target key end

     0   :  { %10 = vsyncpa [#allocation3], 0  ;;  %s4292_s0 = inlined_call_operand.vmem [shape: f32[256,128], index: 0, kind: input, shape index: {}]   ;;  %s4293_s1 = inlined_call_operand.vmem [shape: bf16[128,512], index: 1, kind: input, shape index: {}]   ;;  %s4294_s2 = inlined_call_operand.hbm [shape: f32[1,512], index: 2, kind: input, shape index: {}]   ;;  %s4295_s3 = inlined_call_operand.vmem [shape: bf16[512,256], index: 3, kind: input, shape index: {}]   ;;  %s4296_s4 = inlined_call_operand.hbm [shape: f32[1,256], index: 4, kind: input, shape index: {}]   ;;  %s4297_s5 = inlined_call_operand.vmem [shape: f32[256,256], index: 5, kind: output, shape index: {}]  }
   0x1   :  { %11 = vsyncpa [#allocation5], 0  ;;  %s2946_s18 = smov 0  }
   0x2 LB: > { %s173_s21 = sshll.u32 %s4294_s2, 4  ;;  %s2120_s22 = sadd.s32 4294967295, %s2912_s18   ;;  %s2912_s18 = sphi %s2946_s18, %s17_s18   ;;  %s174_s21 = int_to_ptr.hbm [resolvable:$true] %s173_s21 }
   0x3   : > { %p2122_p0 = scmp.ge.s32.totalorder %s2912_s18, 1  ;;  %p158_p1 = scmp.lt.s32.totalorder %s2912_s18, 3 }
   0x4   : > { %p2957_p2 = scmp.eq.s32.totalorder %s2120_s22, 0  ;;  %s2914_s25 = smov [#allocation2]  }
   0x5   : > { %p2961_p3 = pnand %p2122_p0, %p158_p1  ;;  %s175_s26 = sshll.u32 %s2914_s25, 4  ;;  %s176_s26 = int_to_ptr.vmem [resolvable:$true] %s175_s26 }
   0x6   : > { %s188_s29 = sshll.u32 %s4296_s4, 4  ;;  %s2915_s30 = smov [#allocation4]   ;;  %s189_s29 = int_to_ptr.hbm [resolvable:$true] %s188_s29 }
   0x7   : > { %p2689_p4 = pneg %p2961_p3  ;;  %s190_s6 = sshll.u32 %s2915_s30, 4  ;;  %s191_s6 = int_to_ptr.vmem [resolvable:$true] %s190_s6 }
   0x8   : > { %212 = sbr.rel (%p2961_p3) target bundleno = 624 (0x270), region = 40 }
   0x9   : > { %p2690_p5 = pnand %p2957_p2, %p2689_p4 }
   0xb   : > { %2692 = dma.hbm_to_vmem [thread:$0]  (!%p2690_p5), %s174_s21, 64, %s176_s26, [#allocation3]  }
   0xc   : > { %2695 = dma.hbm_to_vmem [thread:$0]  (!%p2690_p5), %s189_s29, 32, %s191_s6, [#allocation5]  }
   0xd   : > { %2903 = dma.done.wait (%p2957_p2), [#allocation3], 64  }
   0xe   : > { %2905 = vsyncadd (%p2957_p2), [#allocation3], 4294967232 }
   0xf   : > { %2907 = dma.done.wait (%p2957_p2), [#allocation5], 32  }
  0x10   : > { %2909 = vsyncadd (%p2957_p2), [#allocation5], 4294967264  ;;  %s2982_s7 = sshll.u32 %s2120_s22, 4  ;;  %v2248_v0 = vld [vmem:[%s4293_s1 + $0xe0] sm:$0xf] }
  0x11   : > { %v2615_v1 = vld [vmem:[%s4293_s1 + $0xec] sm:$0xf0]  ;;  %v2613_v2 = vld [vmem:[%s4293_s1 + $0xe4] sm:$0xf]  ;;  %v2250_v4 = vld [vmem:[%s4293_s1 + $0xf0] sm:$0xf0] }
  0x12   : > { %v2249_v3 = vor.u32 %v2615_v1, %v2248_v0  ;;  %v2256_v5 = vld [vmem:[%s4293_s1 + $0xe8] sm:$0xf]  ;;  %v2616_v6 = vld [vmem:[%s4293_s1 + $0xf4] sm:$0xf0]  ;;  %v2253_v7 = vor.u32 %v2613_v2, %v2250_v4  ;;  %v2614_v9 = vld [vmem:[%s4293_s1 + $0xec] sm:$0xf] }
  0x13   : > { %v2257_v8 = vor.u32 %v2616_v6, %v2256_v5  ;;  %v2258_v10 = vld [vmem:[%s4293_s1 + $0xf8] sm:$0xf0]  ;;  %v2232_v11 = vld [vmem:[%s4293_s1 + $0xc0] sm:$0xf]  ;;  %v2611_v13 = vld [vmem:[%s4293_s1 + $0xcc] sm:$0xf0] }
  0x14   : > { %486 = vmatpush.bf16.msra.mxu0 %v2249_v3  ;;  %v2261_v12 = vor.u32 %v2614_v9, %v2258_v10  ;;  %v2609_v14 = vld [vmem:[%s4293_s1 + $0xc4] sm:$0xf]  ;;  %v2234_v15 = vld [vmem:[%s4293_s1 + $0xd0] sm:$0xf0]  ;;  %535 = vmatpush.bf16.msra.mxu1 %v2253_v7  ;;  %v2233_v16 = vor.u32 %v2611_v13, %v2232_v11  ;;  %v2240_v18 = vld [vmem:[%s4293_s1 + $0xc8] sm:$0xf] }
  0x15   : > { %584 = vmatpush.bf16.msra.mxu2 %v2257_v8  ;;  %v2237_v17 = vor.u32 %v2609_v14, %v2234_v15  ;;  %v2612_v19 = vld [vmem:[%s4293_s1 + $0xd4] sm:$0xf0]  ;;  %v2610_v20 = vld [vmem:[%s4293_s1 + $0xcc] sm:$0xf]  ;;  %v2242_v22 = vld [vmem:[%s4293_s1 + $0xd8] sm:$0xf0] }
  0x16   : > { %633 = vmatpush.bf16.msra.mxu3 %v2261_v12  ;;  %v2241_v21 = vor.u32 %v2612_v19, %v2240_v18  ;;  %v2216_v23 = vld [vmem:[%s4293_s1 + $0xa0] sm:$0xf]  ;;  %v2607_v24 = vld [vmem:[%s4293_s1 + $0xac] sm:$0xf0]  ;;  %v2245_v25 = vor.u32 %v2610_v20, %v2242_v22  ;;  %v2605_v26 = vld [vmem:[%s4293_s1 + $0xa4] sm:$0xf] }
  0x17   : > { %v2218_v27 = vld [vmem:[%s4293_s1 + $0xb0] sm:$0xf0]  ;;  %v2224_v28 = vld [vmem:[%s4293_s1 + $0xa8] sm:$0xf]  ;;  %v2217_v29 = vor.u32 %v2607_v24, %v2216_v23  ;;  %v2608_v30 = vld [vmem:[%s4293_s1 + $0xb4] sm:$0xf0] }
  0x18   : > { %487 = vmatpush.bf16.msra.mxu0 %v2233_v16  ;;  %v2606_v31 = vld [vmem:[%s4293_s1 + $0xac] sm:$0xf]  ;;  %v2226_v32 = vld [vmem:[%s4293_s1 + $0xb8] sm:$0xf0]  ;;  %536 = vmatpush.bf16.msra.mxu1 %v2237_v17  ;;  %v2221_v33 = vor.u32 %v2605_v26, %v2218_v27  ;;  %v2225_v34 = vor.u32 %v2608_v30, %v2224_v28  ;;  %v2200_v35 = vld [vmem:[%s4293_s1 + $0x80] sm:$0xf] }
  0x19   : > { %585 = vmatpush.bf16.msra.mxu2 %v2241_v21  ;;  %v2603_v36 = vld [vmem:[%s4293_s1 + $0x8c] sm:$0xf0]  ;;  %v2601_v37 = vld [vmem:[%s4293_s1 + $0x84] sm:$0xf]  ;;  %v2229_v38 = vor.u32 %v2606_v31, %v2226_v32  ;;  %v2202_v39 = vld [vmem:[%s4293_s1 + $0x90] sm:$0xf0] }
  0x1a   : > { %634 = vmatpush.bf16.msra.mxu3 %v2245_v25  ;;  %v2208_v40 = vld [vmem:[%s4293_s1 + $0x88] sm:$0xf]  ;;  %v2604_v41 = vld [vmem:[%s4293_s1 + $0x94] sm:$0xf0]  ;;  %v2602_v42 = vld [vmem:[%s4293_s1 + $0x8c] sm:$0xf]  ;;  %v2201_v44 = vor.u32 %v2603_v36, %v2200_v35  ;;  %v2205_v45 = vor.u32 %v2601_v37, %v2202_v39 }
  0x1b   : > { %v2210_v43 = vld [vmem:[%s4293_s1 + $0x98] sm:$0xf0]  ;;  %p248_p6 = scmp.lt.s32.totalorder %s2982_s7, 31  ;;  %v2209_v46 = vor.u32 %v2604_v41, %v2208_v40  ;;  %v2184_v47 = vld [vmem:[%s4293_s1 + $0x60] sm:$0xf] }
  0x1c   : > { %488 = vmatpush.bf16.msra.mxu0 %v2217_v29  ;;  %537 = vmatpush.bf16.msra.mxu1 %v2221_v33  ;;  %v2599_v48 = vld [vmem:[%s4293_s1 + $0x6c] sm:$0xf0]  ;;  %v2597_v49 = vld [vmem:[%s4293_s1 + $0x64] sm:$0xf]  ;;  %v2213_v50 = vor.u32 %v2602_v42, %v2210_v43  ;;  %v2186_v51 = vld [vmem:[%s4293_s1 + $0x70] sm:$0xf0] }
  0x1d   : > { %586 = vmatpush.bf16.msra.mxu2 %v2225_v34  ;;  %v2192_v52 = vld [vmem:[%s4293_s1 + $0x68] sm:$0xf]  ;;  %v2600_v53 = vld [vmem:[%s4293_s1 + $0x74] sm:$0xf0]  ;;  %v2598_v54 = vld [vmem:[%s4293_s1 + $0x6c] sm:$0xf]  ;;  %v2185_v56 = vor.u32 %v2599_v48, %v2184_v47  ;;  %v2189_v57 = vor.u32 %v2597_v49, %v2186_v51 }
  0x1e   : > { %635 = vmatpush.bf16.msra.mxu3 %v2229_v38  ;;  %v2194_v55 = vld [vmem:[%s4293_s1 + $0x78] sm:$0xf0]  ;;  %s4307_s7 = smov (!%p248_p6, %s2982_s7), 31  ;;  %v2193_v58 = vor.u32 %v2600_v53, %v2192_v52  ;;  %v2168_v59 = vld [vmem:[%s4293_s1 + $0x40] sm:$0xf] }
  0x1f   : > { %v2595_v60 = vld [vmem:[%s4293_s1 + $0x4c] sm:$0xf0]  ;;  %v2593_v61 = vld [vmem:[%s4293_s1 + $0x44] sm:$0xf]  ;;  %v2197_v62 = vor.u32 %v2598_v54, %v2194_v55  ;;  %v2170_v63 = vld [vmem:[%s4293_s1 + $0x50] sm:$0xf0] }
  0x20   : > { %489 = vmatpush.bf16.msra.mxu0 %v2201_v44  ;;  %538 = vmatpush.bf16.msra.mxu1 %v2205_v45  ;;  %v2176_v0 = vld [vmem:[%s4293_s1 + $0x48] sm:$0xf]  ;;  %v2596_v1 = vld [vmem:[%s4293_s1 + $0x54] sm:$0xf0]  ;;  %v2594_v2 = vld [vmem:[%s4293_s1 + $0x4c] sm:$0xf]  ;;  %v2169_v4 = vor.u32 %v2595_v60, %v2168_v59  ;;  %v2173_v5 = vor.u32 %v2593_v61, %v2170_v63 }
  0x21   : > { %587 = vmatpush.bf16.msra.mxu2 %v2209_v46  ;;  %v2178_v3 = vld [vmem:[%s4293_s1 + $0x58] sm:$0xf0]  ;;  %s2130_s12 = sshll.u32 %s4307_s7, 3  ;;  %v2177_v6 = vor.u32 %v2596_v1, %v2176_v0  ;;  %v2152_v7 = vld [vmem:[%s4293_s1 + $0x20] sm:$0xf]  ;;  %s2584_s9 = sshll.u32 %s4307_s7, 4 }
  0x22   : > { %636 = vmatpush.bf16.msra.mxu3 %v2213_v50  ;;  %v2591_v8 = vld [vmem:[%s4293_s1 + $0x2c] sm:$0xf0]  ;;  %v2589_v9 = vld [vmem:[%s4293_s1 + $0x24] sm:$0xf]  ;;  %v2181_v10 = vor.u32 %v2594_v2, %v2178_v3  ;;  %v2154_v11 = vld [vmem:[%s4293_s1 + $0x30] sm:$0xf0]  ;;  %s3171_s15 = scalar_lea.vmem %s4292_s0, %s2130_s12  ;;  %s4183_s13 = scalar_lea.vmem %s4297_s5, %s2584_s9 }
  0x23   : > { %v2160_v12 = vld [vmem:[%s4293_s1 + $0x28] sm:$0xf]  ;;  %v2592_v13 = vld [vmem:[%s4293_s1 + $0x34] sm:$0xf0]  ;;  %v2590_v14 = vld [vmem:[%s4293_s1 + $0x2c] sm:$0xf]  ;;  %v2153_v16 = vor.u32 %v2591_v8, %v2152_v7  ;;  %v2157_v17 = vor.u32 %v2589_v9, %v2154_v11 }
  0x24   : > { %490 = vmatpush.bf16.msra.mxu0 %v2185_v56  ;;  %539 = vmatpush.bf16.msra.mxu1 %v2189_v57  ;;  %v2162_v15 = vld [vmem:[%s4293_s1 + $0x38] sm:$0xf0]  ;;  %v2161_v18 = vor.u32 %v2592_v13, %v2160_v12  ;;  %v2136_v19 = vld [vmem:[%s4293_s1] sm:$0xf]  ;;  %v2587_v20 = vld [vmem:[%s4293_s1 + $0xc] sm:$0xf0] }
  0x25   : > { %588 = vmatpush.bf16.msra.mxu2 %v2193_v58  ;;  %v2585_v21 = vld [vmem:[%s4293_s1 + $0x4] sm:$0xf]  ;;  %v2165_v22 = vor.u32 %v2590_v14, %v2162_v15  ;;  %v2138_v23 = vld [vmem:[%s4293_s1 + $0x10] sm:$0xf0]  ;;  %v2144_v24 = vld [vmem:[%s4293_s1 + $0x8] sm:$0xf]  ;;  %v2137_v28 = vor.u32 %v2587_v20, %v2136_v19 }
  0x26   : > { %637 = vmatpush.bf16.msra.mxu3 %v2197_v62  ;;  %v2588_v25 = vld [vmem:[%s4293_s1 + $0x14] sm:$0xf0]  ;;  %v2586_v26 = vld [vmem:[%s4293_s1 + $0xc] sm:$0xf]  ;;  %v2146_v27 = vld [vmem:[%s4293_s1 + $0x18] sm:$0xf0]  ;;  %v2141_v31 = vor.u32 %v2585_v21, %v2138_v23 }
  0x27   : > { %v260_v29 = vld [vmem:[%s3171_s15] sm:$0xff]  ;;  %v261_v30 = vld [vmem:[%s3171_s15 + $0x8] sm:$0xff]  ;;  %v2145_v32 = vor.u32 %v2588_v25, %v2144_v24  ;;  %v2149_v33 = vor.u32 %v2586_v26, %v2146_v27  ;;  %v2512_v35 = vld [vmem:[%s4295_s3 + $0x170] sm:$0xf] }
  0x28   : > { %491 = vmatpush.bf16.msra.mxu0 %v2169_v4  ;;  %540 = vmatpush.bf16.msra.mxu1 %v2173_v5  ;;  %v276_v34 = vpack.c.bf16 %v261_v30, %v260_v29  ;;  %v2664_v36 = vld [vmem:[%s4295_s3 + $0x174] sm:$0xf0]  ;;  %v2384_v37 = vld [vmem:[%s4295_s3 + $0x70] sm:$0xf]  ;;  %v2504_v50 = vld [vmem:[%s4295_s3 + $0x160] sm:$0xf] }
  0x29   : > { %589 = vmatpush.bf16.msra.mxu2 %v2177_v6  ;;  %v2513_v38 = vor.u32 %v2664_v36, %v2512_v35  ;;  %v2632_v39 = vld [vmem:[%s4295_s3 + $0x74] sm:$0xf0]  ;;  %v2576_v40 = vld [vmem:[%s4295_s3 + $0x1f0] sm:$0xf]  ;;  %v2662_v51 = vld [vmem:[%s4295_s3 + $0x164] sm:$0xf0] }
  0x2a   : > { %638 = vmatpush.bf16.msra.mxu3 %v2181_v10  ;;  %v2680_v41 = vld [vmem:[%s4295_s3 + $0x1f4] sm:$0xf0]  ;;  %v2385_v42 = vor.u32 %v2632_v39, %v2384_v37  ;;  %v2448_v44 = vld [vmem:[%s4295_s3 + $0xf0] sm:$0xf]  ;;  %v2376_v52 = vld [vmem:[%s4295_s3 + $0x60] sm:$0xf]  ;;  %v2505_v53 = vor.u32 %v2662_v51, %v2504_v50 }
  0x2b   : > { %v2577_v43 = vor.u32 %v2680_v41, %v2576_v40  ;;  %v2648_v45 = vld [vmem:[%s4295_s3 + $0xf4] sm:$0xf0]  ;;  %v262_v47 = vld [vmem:[%s3171_s15 + $0x10] sm:$0xff]  ;;  %v2630_v54 = vld [vmem:[%s4295_s3 + $0x64] sm:$0xf0] }
  0x2c   : > { %492 = vmatpush.bf16.msra.mxu0 %v2153_v16  ;;  %541 = vmatpush.bf16.msra.mxu1 %v2157_v17  ;;  %v2449_v46 = vor.u32 %v2648_v45, %v2448_v44  ;;  %v263_v48 = vld [vmem:[%s3171_s15 + $0x18] sm:$0xff]  ;;  %v2568_v55 = vld [vmem:[%s4295_s3 + $0x1e0] sm:$0xf]  ;;  %v2678_v56 = vld [vmem:[%s4295_s3 + $0x1e4] sm:$0xf0]  ;;  %v2377_v57 = vor.u32 %v2630_v54, %v2376_v52 }
  0x2d   : > { %590 = vmatpush.bf16.msra.mxu2 %v2161_v18  ;;  %v277_v49 = vpack.c.bf16 %v263_v48, %v262_v47  ;;  %v2569_v58 = vor.u32 %v2678_v56, %v2568_v55  ;;  %v2440_v59 = vld [vmem:[%s4295_s3 + $0xe0] sm:$0xf]  ;;  %v2646_v60 = vld [vmem:[%s4295_s3 + $0xe4] sm:$0xf0]  ;;  %v2496_v1 = vld [vmem:[%s4295_s3 + $0x150] sm:$0xf] }
  0x2e   : > { %639 = vmatpush.bf16.msra.mxu3 %v2165_v22  ;;  %v2441_v61 = vor.u32 %v2646_v60, %v2440_v59  ;;  %v264_v62 = vld [vmem:[%s3171_s15 + $0x20] sm:$0xff]  ;;  %v265_v63 = vld [vmem:[%s3171_s15 + $0x28] sm:$0xff]  ;;  %v2660_v2 = vld [vmem:[%s4295_s3 + $0x154] sm:$0xf0] }
  0x2f   : > { %v278_v0 = vpack.c.bf16 %v265_v63, %v264_v62  ;;  %v2368_v3 = vld [vmem:[%s4295_s3 + $0x50] sm:$0xf]  ;;  %v2497_v4 = vor.u32 %v2660_v2, %v2496_v1  ;;  %v2628_v5 = vld [vmem:[%s4295_s3 + $0x54] sm:$0xf0]  ;;  %v2488_v16 = vld [vmem:[%s4295_s3 + $0x140] sm:$0xf] }
  0x30   : > { %493 = vmatpush.bf16.msra.mxu0 %v2137_v28  ;;  %542 = vmatpush.bf16.msra.mxu1 %v2141_v31  ;;  %v2560_v6 = vld [vmem:[%s4295_s3 + $0x1d0] sm:$0xf]  ;;  %v2676_v7 = vld [vmem:[%s4295_s3 + $0x1d4] sm:$0xf0]  ;;  %v2369_v8 = vor.u32 %v2628_v5, %v2368_v3  ;;  %v2658_v17 = vld [vmem:[%s4295_s3 + $0x144] sm:$0xf0] }
  0x31   : > { %591 = vmatpush.bf16.msra.mxu2 %v2145_v32  ;;  %v2561_v9 = vor.u32 %v2676_v7, %v2560_v6  ;;  %v2432_v10 = vld [vmem:[%s4295_s3 + $0xd0] sm:$0xf]  ;;  %v2644_v11 = vld [vmem:[%s4295_s3 + $0xd4] sm:$0xf0]  ;;  %v2360_v18 = vld [vmem:[%s4295_s3 + $0x40] sm:$0xf]  ;;  %v2489_v19 = vor.u32 %v2658_v17, %v2488_v16 }
  0x32   : > { %640 = vmatpush.bf16.msra.mxu3 %v2149_v33  ;;  %v2433_v12 = vor.u32 %v2644_v11, %v2432_v10  ;;  %v266_v13 = vld [vmem:[%s3171_s15 + $0x30] sm:$0xff]  ;;  %v267_v14 = vld [vmem:[%s3171_s15 + $0x38] sm:$0xff]  ;;  %v2626_v20 = vld [vmem:[%s4295_s3 + $0x44] sm:$0xf0] }
  0x33   : > { %494 = vmatmul.bf16.vlgmr.msra.gmra.mxu0 %v276_v34  ;;  %543 = vmatmul.bf16.vlgmr.msra.gmra.mxu1 %v276_v34  ;;  %v279_v15 = vpack.c.bf16 %v267_v14, %v266_v13  ;;  %v2552_v21 = vld [vmem:[%s4295_s3 + $0x1c0] sm:$0xf]  ;;  %v2674_v22 = vld [vmem:[%s4295_s3 + $0x1c4] sm:$0xf0]  ;;  %v2361_v23 = vor.u32 %v2626_v20, %v2360_v18  ;;  %v2480_v31 = vld [vmem:[%s4295_s3 + $0x130] sm:$0xf] }
  0x34   : > { %592 = vmatmul.bf16.vlgmr.msra.gmra.mxu2 %v276_v34  ;;  %1616 = vmatpush.bf16.msrb.mxu0 %v2385_v42  ;;  %v2553_v24 = vor.u32 %v2674_v22, %v2552_v21  ;;  %v2424_v25 = vld [vmem:[%s4295_s3 + $0xc0] sm:$0xf]  ;;  %v2642_v26 = vld [vmem:[%s4295_s3 + $0xc4] sm:$0xf0]  ;;  %v2656_v32 = vld [vmem:[%s4295_s3 + $0x134] sm:$0xf0] }
  0x35   : > { %641 = vmatmul.bf16.vlgmr.msra.gmra.mxu3 %v276_v34  ;;  %1714 = vmatpush.bf16.msrb.mxu2 %v2513_v38  ;;  %v2425_v27 = vor.u32 %v2642_v26, %v2424_v25  ;;  %v268_v28 = vld [vmem:[%s3171_s15 + $0x40] sm:$0xff]  ;;  %v269_v29 = vld [vmem:[%s3171_s15 + $0x48] sm:$0xff]  ;;  %v2352_v33 = vld [vmem:[%s4295_s3 + $0x30] sm:$0xf]  ;;  %v2481_v34 = vor.u32 %v2656_v32, %v2480_v31 }
  0x36   : > { %1763 = vmatpush.bf16.msrb.mxu3 %v2577_v43  ;;  %1665 = vmatpush.bf16.msrb.mxu1 %v2449_v46  ;;  %v280_v30 = vpack.c.bf16 %v269_v29, %v268_v28  ;;  %v2624_v35 = vld [vmem:[%s4295_s3 + $0x34] sm:$0xf0]  ;;  %v2544_v36 = vld [vmem:[%s4295_s3 + $0x1b0] sm:$0xf]  ;;  %v2472_v46 = vld [vmem:[%s4295_s3 + $0x120] sm:$0xf] }
  0x37   : > { %v2672_v37 = vld [vmem:[%s4295_s3 + $0x1b4] sm:$0xf0]  ;;  %v2353_v38 = vor.u32 %v2624_v35, %v2352_v33  ;;  %v2416_v40 = vld [vmem:[%s4295_s3 + $0xb0] sm:$0xf]  ;;  %v2654_v47 = vld [vmem:[%s4295_s3 + $0x124] sm:$0xf0] }
  0x38   : > { %1617 = vmatpush.bf16.msrb.mxu0 %v2377_v57  ;;  %v2545_v39 = vor.u32 %v2672_v37, %v2544_v36  ;;  %v2640_v41 = vld [vmem:[%s4295_s3 + $0xb4] sm:$0xf0]  ;;  %v270_v43 = vld [vmem:[%s3171_s15 + $0x50] sm:$0xff]  ;;  %v2344_v48 = vld [vmem:[%s4295_s3 + $0x20] sm:$0xf] }
  0x39   : > { %1715 = vmatpush.bf16.msrb.mxu2 %v2505_v53  ;;  %v2417_v42 = vor.u32 %v2640_v41, %v2416_v40  ;;  %v271_v44 = vld [vmem:[%s3171_s15 + $0x58] sm:$0xff]  ;;  %v2622_v50 = vld [vmem:[%s4295_s3 + $0x24] sm:$0xf0]  ;;  %v2536_v51 = vld [vmem:[%s4295_s3 + $0x1a0] sm:$0xf] }
  0x3a   : > { %1764 = vmatpush.bf16.msrb.mxu3 %v2569_v58  ;;  %1666 = vmatpush.bf16.msrb.mxu1 %v2441_v61  ;;  %v281_v45 = vpack.c.bf16 %v271_v44, %v270_v43  ;;  %v2670_v52 = vld [vmem:[%s4295_s3 + $0x1a4] sm:$0xf0]  ;;  %v2345_v53 = vor.u32 %v2622_v50, %v2344_v48  ;;  %v2408_v55 = vld [vmem:[%s4295_s3 + $0xa0] sm:$0xf]  ;;  %v274_v61 = vld [vmem:[%s3171_s15 + $0x70] sm:$0xff] }
  0x3b   : > { %v2537_v54 = vor.u32 %v2670_v52, %v2536_v51  ;;  %v2638_v56 = vld [vmem:[%s4295_s3 + $0xa4] sm:$0xf0]  ;;  %v272_v58 = vld [vmem:[%s3171_s15 + $0x60] sm:$0xff]  ;;  %v275_v62 = vld [vmem:[%s3171_s15 + $0x78] sm:$0xff] }
  0x3c   : > { %1618 = vmatpush.bf16.msrb.mxu0 %v2369_v8  ;;  %v2409_v57 = vor.u32 %v2638_v56, %v2408_v55  ;;  %v273_v59 = vld [vmem:[%s3171_s15 + $0x68] sm:$0xff]  ;;  %v283_v63 = vpack.c.bf16 %v275_v62, %v274_v61  ;;  %v2652_v1 = vld [vmem:[%s4295_s3 + $0x114] sm:$0xf0]  ;;  %v2336_v3 = vld [vmem:[%s4295_s3 + $0x10] sm:$0xf] }
  0x3d   : > { %1716 = vmatpush.bf16.msrb.mxu2 %v2497_v4  ;;  %v282_v60 = vpack.c.bf16 %v273_v59, %v272_v58  ;;  %v2620_v4 = vld [vmem:[%s4295_s3 + $0x14] sm:$0xf0]  ;;  %v2400_v5 = vld [vmem:[%s4295_s3 + $0x90] sm:$0xf]  ;;  %v2618_v14 = vld [vmem:[%s4295_s3 + $0x4] sm:$0xf0] }
  0x3e   : > { %1765 = vmatpush.bf16.msrb.mxu3 %v2561_v9  ;;  %1667 = vmatpush.bf16.msrb.mxu1 %v2433_v12  ;;  %v2337_v6 = vor.u32 %v2620_v4, %v2336_v3  ;;  %v2636_v7 = vld [vmem:[%s4295_s3 + $0x94] sm:$0xf0]  ;;  %v316_v9 = vld [vmem:[#allocation2] sm:$0xf]  ;;  %v2528_v10 = vld [vmem:[%s4295_s3 + $0x190] sm:$0xf] }
  0x3f   : > { %v2401_v8 = vor.u32 %v2636_v7, %v2400_v5  ;;  %v2668_v11 = vld [vmem:[%s4295_s3 + $0x194] sm:$0xf0]  ;;  %v2328_v12 = vld [vmem:[%s4295_s3] sm:$0xf]  ;;  %v2634_v18 = vld [vmem:[%s4295_s3 + $0x84] sm:$0xf0] }
  0x40   : > { %1619 = vmatpush.bf16.msrb.mxu0 %v2361_v23  ;;  %v2529_v13 = vor.u32 %v2668_v11, %v2528_v10  ;;  %v2329_v16 = vor.u32 %v2618_v14, %v2328_v12  ;;  %v2392_v17 = vld [vmem:[%s4295_s3 + $0x80] sm:$0xf]  ;;  %v2650_v23 = vld [vmem:[%s4295_s3 + $0x104] sm:$0xf0]  ;;  %v3408_v33 = vperm.slane %v316_v9, 2  ;;  %v3410_v35 = vperm.slane %v316_v9, 3 }
  0x41   : > { %1717 = vmatpush.bf16.msrb.mxu2 %v2489_v19  ;;  %v3386_v19 = vperm.slane %v316_v9, 1  ;;  %v2393_v20 = vor.u32 %v2634_v18, %v2392_v17  ;;  %v2456_v22 = vld [vmem:[%s4295_s3 + $0x100] sm:$0xf]  ;;  %v2666_v28 = vld [vmem:[%s4295_s3 + $0x184] sm:$0xf0] }
  0x42   : > { %1766 = vmatpush.bf16.msrb.mxu3 %v2553_v24  ;;  %1668 = vmatpush.bf16.msrb.mxu1 %v2425_v27  ;;  %v2457_v26 = vor.u32 %v2650_v23, %v2456_v22  ;;  %v2520_v27 = vld [vmem:[%s4295_s3 + $0x180] sm:$0xf]  ;;  %v2663_v4 = vld [vmem:[%s4295_s3 + $0x174] sm:$0xf]  ;;  %v2514_v5 = vld [vmem:[%s4295_s3 + $0x178] sm:$0xf0] }
  0x43   : > { %499 = vmatmul.bf16.gmra.mxu0 %v277_v49  ;;  %548 = vmatmul.bf16.gmra.mxu1 %v277_v49 }
  0x44   : > { %597 = vmatmul.bf16.gmra.mxu2 %v277_v49  ;;  %1620 = vmatpush.bf16.msrb.mxu0 %v2353_v38 }
  0x45   : > { %646 = vmatmul.bf16.gmra.mxu3 %v277_v49  ;;  %1718 = vmatpush.bf16.msrb.mxu2 %v2481_v34  ;;  %v2473_v49 = vor.u32 %v2654_v47, %v2472_v46 }
  0x46   : > { %1767 = vmatpush.bf16.msrb.mxu3 %v2545_v39  ;;  %1669 = vmatpush.bf16.msrb.mxu1 %v2417_v42 }
  0x48   : > { %1621 = vmatpush.bf16.msrb.mxu0 %v2345_v53 }
  0x49   : > { %1719 = vmatpush.bf16.msrb.mxu2 %v2473_v49 }
  0x4a   : > { %1768 = vmatpush.bf16.msrb.mxu3 %v2537_v54  ;;  %1670 = vmatpush.bf16.msrb.mxu1 %v2409_v57 }
  0x4c   : > { %1622 = vmatpush.bf16.msrb.mxu0 %v2337_v6 }
  0x4e   : > { %1671 = vmatpush.bf16.msrb.mxu1 %v2401_v8  ;;  %1769 = vmatpush.bf16.msrb.mxu3 %v2529_v13 }
  0x50   : > { %1623 = vmatpush.bf16.msrb.mxu0 %v2329_v16  ;;  %v2517_v16 = vor.u32 %v2663_v4, %v2514_v5 }
  0x52   : > { %1672 = vmatpush.bf16.msrb.mxu1 %v2393_v20 }
  0x53   : > { %504 = vmatmul.bf16.gmra.mxu0 %v278_v0  ;;  %553 = vmatmul.bf16.gmra.mxu1 %v278_v0 }
  0x54   : > { %602 = vmatmul.bf16.gmra.mxu2 %v278_v0 }
  0x55   : > { %651 = vmatmul.bf16.gmra.mxu3 %v278_v0  ;;  %v2464_v0 = vld [vmem:[%s4295_s3 + $0x110] sm:$0xf] }
  0x56   : > { %v2465_v2 = vor.u32 %v2652_v1, %v2464_v0 }
  0x58   : > { %1720 = vmatpush.bf16.msrb.mxu2 %v2465_v2 }
  0x5c   : > { %1721 = vmatpush.bf16.msrb.mxu2 %v2457_v26 }
  0x60   : > { %1910 = vmatpush.bf16.msra.mxu2 %v2517_v16  ;;  %v2679_v16 = vld [vmem:[%s4295_s3 + $0x1f4] sm:$0xf] }
  0x63   : > { %509 = vmatmul.bf16.gmra.mxu0 %v279_v15  ;;  %558 = vmatmul.bf16.gmra.mxu1 %v279_v15 }
  0x64   : > { %607 = vmatmul.bf16.gmra.mxu2 %v279_v15 }
  0x65   : > { %656 = vmatmul.bf16.gmra.mxu3 %v279_v15  ;;  %v3378_v15 = vperm.slane %v316_v9, 0 }
  0x73   : > { %514 = vmatmul.bf16.gmra.mxu0 %v280_v30  ;;  %563 = vmatmul.bf16.gmra.mxu1 %v280_v30 }
  0x74   : > { %612 = vmatmul.bf16.gmra.mxu2 %v280_v30 }
  0x75   : > { %661 = vmatmul.bf16.gmra.mxu3 %v280_v30  ;;  %v2521_v30 = vor.u32 %v2666_v28, %v2520_v27 }
  0x77   : > { %1770 = vmatpush.bf16.msrb.mxu3 %v2521_v30 }
  0x83   : > { %519 = vmatmul.bf16.gmra.mxu0 %v281_v45  ;;  %568 = vmatmul.bf16.gmra.mxu1 %v281_v45 }
  0x84   : > { %617 = vmatmul.bf16.gmra.mxu2 %v281_v45 }
  0x85   : > { %666 = vmatmul.bf16.gmra.mxu3 %v281_v45 }
  0x93   : > { %524 = vmatmul.bf16.gmra.mxu0 %v282_v60  ;;  %573 = vmatmul.bf16.gmra.mxu1 %v282_v60 }
  0x94   : > { %622 = vmatmul.bf16.gmra.mxu2 %v282_v60 }
  0x95   : > { %671 = vmatmul.bf16.gmra.mxu3 %v282_v60 }
  0xa3   : > { %529 = vmatmul.bf16.gmra.mxu0 %v283_v63  ;;  %578 = vmatmul.bf16.gmra.mxu1 %v283_v63 }
  0xa4   : > { %627 = vmatmul.bf16.gmra.mxu2 %v283_v63 }
  0xa5   : > { %676 = vmatmul.bf16.gmra.mxu3 %v283_v63 }
  0xb0   : > { %v495_v21 = vpop.f32.mrf.mxu0  ;;  %v544_v25 = vpop.f32.mrf.mxu1 }
  0xb1   : > { %v3395_v24 = vadd.f32 %v495_v21, %v3378_v15  ;;  %v3404_v29 = vadd.f32 %v544_v25, %v3386_v19 }
  0xb3   : > { %v682_v31 = vmin.f32 %v3395_v24, 0.0  ;;  %v683_v32 = vmin.f32 %v3404_v29, 0.0  ;;  %vm1002_vm0 = vcmp.gt.f32.partialorder %v3395_v24, 0.0  ;;  %vm1003_vm1 = vcmp.gt.f32.partialorder %v3404_v29, 0.0 }
  0xb5   : > { %v746_v34 = vmul.f32 1.442695, %v682_v31  ;;  %v748_v36 = vmul.f32 1.442695, %v683_v32 }
  0xb7   : > { %2710 = vpow2.f32 %v746_v34  ;;  %v593_v37 = vpop.f32.mrf.mxu2 }
  0xb8   : > { %2712 = vpow2.f32 %v748_v36  ;;  %v3413_v38 = vadd.f32 %v593_v37, %v3408_v33  ;;  %v642_v39 = vpop.f32.mrf.mxu3  ;;  %v497_v40 = vpop.f32.mrf.mxu0 }
  0xb9   : > { %v3416_v41 = vadd.f32 %v642_v39, %v3410_v35  ;;  %v3419_v42 = vadd.f32 %v497_v40, %v3378_v15  ;;  %v546_v43 = vpop.f32.mrf.mxu1 }
  0xba   : > { %v684_v44 = vmin.f32 %v3413_v38, 0.0  ;;  %v3423_v45 = vadd.f32 %v546_v43, %v3386_v19  ;;  %vm1004_vm2 = vcmp.gt.f32.partialorder %v3413_v38, 0.0 }
  0xbb   : > { %v685_v46 = vmin.f32 %v3416_v41, 0.0  ;;  %v686_v47 = vmin.f32 %v3419_v42, 0.0  ;;  %vm1005_vm3 = vcmp.gt.f32.partialorder %v3416_v41, 0.0  ;;  %vm1006_vm4 = vcmp.gt.f32.partialorder %v3419_v42, 0.0 }
  0xbc   : > { %v750_v48 = vmul.f32 1.442695, %v684_v44  ;;  %v687_v49 = vmin.f32 %v3423_v45, 0.0  ;;  %vm1007_vm5 = vcmp.gt.f32.partialorder %v3423_v45, 0.0 }
  0xbd   : > { %v2711_v50 = vpop.eup %2710  ;;  %v752_v51 = vmul.f32 1.442695, %v685_v46  ;;  %v754_v52 = vmul.f32 1.442695, %v686_v47 }
  0xbe   : > { %v2713_v53 = vpop.eup %2712  ;;  %v2262_v54 = vadd.f32 -1.0, %v2711_v50  ;;  %2714 = vpow2.f32 %v750_v48  ;;  %v756_v55 = vmul.f32 1.442695, %v687_v49 }
  0xbf   : > { %2716 = vpow2.f32 %v752_v51  ;;  %v595_v56 = vpop.f32.mrf.mxu2  ;;  %v2263_v57 = vadd.f32 -1.0, %v2713_v53 }
  0xc0   : > { %2718 = vpow2.f32 %v754_v52  ;;  %v3429_v58 = vadd.f32 %v595_v56, %v3408_v33  ;;  %v644_v59 = vpop.f32.mrf.mxu3  ;;  %v500_v60 = vpop.f32.mrf.mxu0  ;;  %v938_v0 = vmul.f32 1.6732632, %v2262_v54 }
  0xc1   : > { %2720 = vpow2.f32 %v756_v55  ;;  %v3432_v61 = vadd.f32 %v644_v59, %v3410_v35  ;;  %v3435_v62 = vadd.f32 %v500_v60, %v3378_v15  ;;  %v549_v63 = vpop.f32.mrf.mxu1  ;;  %v939_v7 = vmul.f32 1.6732632, %v2263_v57 }
  0xc2   : > { %v688_v1 = vmin.f32 %v3429_v58, 0.0  ;;  %v3440_v3 = vadd.f32 %v549_v63, %v3386_v19  ;;  %v1066_v14 = vsel %vm1002_vm0, %v3395_v24, %v938_v0  ;;  %vm1008_vm6 = vcmp.gt.f32.partialorder %v3429_v58, 0.0 }
  0xc3   : > { %v689_v2 = vmin.f32 %v3432_v61, 0.0  ;;  %v690_v12 = vmin.f32 %v3435_v62, 0.0  ;;  %v1067_v23 = vsel %vm1003_vm1, %v3404_v29, %v939_v7  ;;  %v1130_v34 = vmul.f32 1.050701, %v1066_v14 }
  0xc4   : > { %v2715_v6 = vpop.eup %2714  ;;  %v758_v8 = vmul.f32 1.442695, %v688_v1  ;;  %v691_v21 = vmin.f32 %v3440_v3, 0.0  ;;  %v1131_v29 = vmul.f32 1.050701, %v1067_v23  ;;  %vm1009_vm7 = vcmp.gt.f32.partialorder %v3432_v61, 0.0 }
  0xc5   : > { %v2717_v9 = vpop.eup %2716  ;;  %v2264_v10 = vadd.f32 -1.0, %v2715_v6  ;;  %v760_v11 = vmul.f32 1.442695, %v689_v2  ;;  %v762_v31 = vmul.f32 1.442695, %v690_v12  ;;  %vm1010_vm8 = vcmp.gt.f32.partialorder %v3435_v62, 0.0 }
  0xc6   : > { %v2719_v13 = vpop.eup %2718  ;;  %2722 = vpow2.f32 %v758_v8  ;;  %v2265_v18 = vadd.f32 -1.0, %v2717_v9  ;;  %v764_v39 = vmul.f32 1.442695, %v691_v21  ;;  %v2631_v9 = vld [vmem:[%s4295_s3 + $0x74] sm:$0xf]  ;;  %vm1011_vm10 = vcmp.gt.f32.partialorder %v3440_v3, 0.0 }
  0xc7   : > { %v2721_v17 = vpop.eup %2720  ;;  %v2266_v20 = vadd.f32 -1.0, %v2719_v13  ;;  %2724 = vpow2.f32 %v760_v11  ;;  %v598_v22 = vpop.f32.mrf.mxu2  ;;  %v940_v28 = vmul.f32 1.6732632, %v2264_v10  ;;  %v2386_v10 = vld [vmem:[%s4295_s3 + $0x78] sm:$0xf0] }
  0xc8   : > { %v2267_v25 = vadd.f32 -1.0, %v2721_v17  ;;  %v3457_v26 = vadd.f32 %v598_v22, %v3408_v33  ;;  %v647_v24 = vpop.f32.mrf.mxu3  ;;  %v502_v27 = vpop.f32.mrf.mxu0  ;;  %v941_v37 = vmul.f32 1.6732632, %v2265_v18  ;;  %2726 = vpow2.f32 %v762_v31  ;;  %v2578_v17 = vld [vmem:[%s4295_s3 + $0x1f8] sm:$0xf0] }
  0xc9   : > { %v942_v30 = vmul.f32 1.6732632, %v2266_v20  ;;  %v551_v32 = vpop.f32.mrf.mxu1  ;;  %v3462_v40 = vadd.f32 %v647_v24, %v3410_v35  ;;  %v3466_v46 = vadd.f32 %v502_v27, %v3378_v15  ;;  %v1068_v50 = vsel %vm1004_vm2, %v3413_v38, %v940_v28  ;;  %v2450_v24 = vld [vmem:[%s4295_s3 + $0xf8] sm:$0xf0] }
  0xca   : > { %v943_v36 = vmul.f32 1.6732632, %v2267_v25  ;;  %v692_v44 = vmin.f32 %v3457_v26, 0.0  ;;  %v3469_v47 = vadd.f32 %v551_v32, %v3386_v19  ;;  %2728 = vpow2.f32 %v764_v39  ;;  %v2647_v25 = vld [vmem:[%s4295_s3 + $0xf4] sm:$0xf] }
  0xcb   : > { %v1070_v48 = vsel %vm1006_vm4, %v3419_v42, %v942_v30  ;;  %v694_v54 = vmin.f32 %v3466_v46, 0.0  ;;  %v1069_v42 = vsel %vm1005_vm3, %v3416_v41, %v941_v37  ;;  %v693_v63 = vmin.f32 %v3462_v40, 0.0 }
  0xcc   : > { %v2723_v43 = vpop.eup %2722  ;;  %v1134_v52 = vmul.f32 1.050701, %v1070_v48  ;;  %v695_v55 = vmin.f32 %v3469_v47, 0.0  ;;  %v1071_v56 = vsel %vm1007_vm5, %v3423_v45, %v943_v36  ;;  %v766_v60 = vmul.f32 1.442695, %v692_v44 }
  0xcd   : > { %v2725_v49 = vpop.eup %2724  ;;  %v2268_v51 = vadd.f32 -1.0, %v2723_v43  ;;  %v770_v0 = vmul.f32 1.442695, %v694_v54  ;;  %v1135_v6 = vmul.f32 1.050701, %v1071_v56  ;;  %vm1014_vm9 = vcmp.gt.f32.partialorder %v3466_v46, 0.0 }
  0xce   : > { %v2269_v53 = vadd.f32 -1.0, %v2725_v49  ;;  %v3483_v38 = vpack.c.bf16 %v1134_v52, %v1130_v34  ;;  %v772_v45 = vmul.f32 1.442695, %v695_v55  ;;  %v2727_v11 = vpop.eup %2726  ;;  %v1132_v18 = vmul.f32 1.050701, %v1068_v50 }
  0xcf   : > { %v944_v57 = vmul.f32 1.6732632, %v2268_v51  ;;  %v600_v59 = vpop.f32.mrf.mxu2  ;;  %2730 = vpow2.f32 %v770_v0  ;;  %v3505_v13 = vpack.c.bf16 %v1135_v6, %v1131_v29  ;;  %v1133_v20 = vmul.f32 1.050701, %v1069_v42 }
  0xd0   : > { %v3487_v1 = vadd.f32 %v600_v59, %v3408_v33  ;;  %v649_v2 = vpop.f32.mrf.mxu3  ;;  %v505_v4 = vpop.f32.mrf.mxu0  ;;  %v945_v5 = vmul.f32 1.6732632, %v2269_v53  ;;  %1624 = vmatmul.bf16.vlgmr.msrb.gmra.mxu0 %v3483_v38  ;;  %2732 = vpow2.f32 %v772_v45  ;;  %v768_v23 = vmul.f32 1.442695, %v693_v63 }
  0xd1   : > { %v3491_v41 = vadd.f32 %v505_v4, %v3378_v15  ;;  %v554_v7 = vpop.f32.mrf.mxu1  ;;  %v3495_v8 = vadd.f32 %v649_v2, %v3410_v35  ;;  %v1072_v14 = vsel %vm1008_vm6, %v3429_v58, %v944_v57  ;;  %v2729_v22 = vpop.eup %2728  ;;  %2734 = vpow2.f32 %v766_v60  ;;  %1673 = vmatmul.bf16.vlgmr.msrb.gmra.mxu1 %v3505_v13 }
  0xd2   : > { %v696_v12 = vmin.f32 %v3487_v1, 0.0  ;;  %v1073_v58 = vsel %vm1009_vm7, %v3432_v61, %v945_v5  ;;  %v2270_v27 = vadd.f32 -1.0, %v2727_v11  ;;  %v3525_v30 = vadd.f32 %v554_v7, %v3386_v19 }
  0xd3   : > { %v698_v21 = vmin.f32 %v3491_v41, 0.0  ;;  %v697_v28 = vmin.f32 %v3495_v8, 0.0  ;;  %v1136_v31 = vmul.f32 1.050701, %v1072_v14  ;;  %v1137_v34 = vmul.f32 1.050701, %v1073_v58 }
  0xd4   : > { %v774_v32 = vmul.f32 1.442695, %v696_v12  ;;  %v2389_v29 = vor.u32 %v2631_v9, %v2386_v10  ;;  %v2581_v61 = vor.u32 %v2679_v16, %v2578_v17  ;;  %v2453_v50 = vor.u32 %v2647_v25, %v2450_v24 }
  0xd5   : > { %v2731_v37 = vpop.eup %2730  ;;  %v778_v39 = vmul.f32 1.442695, %v698_v21  ;;  %v3527_v43 = vpack.c.bf16 %v1136_v31, %v1132_v18  ;;  %2736 = vpow2.f32 %v768_v23  ;;  %v3532_v51 = vpack.c.bf16 %v1137_v34, %v1133_v20 }
  0xd6   : > { %1812 = vmatpush.bf16.msra.mxu0 %v2389_v29  ;;  %1959 = vmatpush.bf16.msra.mxu3 %v2581_v61  ;;  %v2733_v54 = vpop.eup %2732  ;;  %v699_v55 = vmin.f32 %v3525_v30, 0.0  ;;  %v2274_v57 = vadd.f32 -1.0, %v2731_v37  ;;  %v2271_v60 = vadd.f32 -1.0, %v2729_v22  ;;  %2738 = vpow2.f32 %v774_v32 }
  0xd7   : > { %v603_v36 = vpop.f32.mrf.mxu2  ;;  %1722 = vmatmul.bf16.vlgmr.msrb.gmra.mxu2 %v3527_v43  ;;  %1861 = vmatpush.bf16.msra.mxu1 %v2453_v50  ;;  %v2735_v59 = vpop.eup %2734  ;;  %v776_v63 = vmul.f32 1.442695, %v697_v28  ;;  %v946_v0 = vmul.f32 1.6732632, %v2270_v27  ;;  %2740 = vpow2.f32 %v778_v39  ;;  %v2275_v6 = vadd.f32 -1.0, %v2733_v54 }
  0xd8   : > { %v3530_v44 = vadd.f32 %v603_v36, %v3408_v33  ;;  %v652_v48 = vpop.f32.mrf.mxu3  ;;  %v507_v49 = vpop.f32.mrf.mxu0  ;;  %1771 = vmatmul.bf16.vlgmr.msrb.gmra.mxu3 %v3532_v51  ;;  %v950_v4 = vmul.f32 1.6732632, %v2274_v57  ;;  %v780_v7 = vmul.f32 1.442695, %v699_v55  ;;  %v947_v18 = vmul.f32 1.6732632, %v2271_v60 }
  0xd9   : > { %v3535_v52 = vadd.f32 %v652_v48, %v3410_v35  ;;  %v556_v53 = vpop.f32.mrf.mxu1  ;;  %v3540_v56 = vadd.f32 %v507_v49, %v3378_v15  ;;  %v1074_v45 = vsel %vm1010_vm8, %v3435_v62, %v946_v0  ;;  %2742 = vpow2.f32 %v776_v63  ;;  %v2661_v54 = vld [vmem:[%s4295_s3 + $0x164] sm:$0xf]  ;;  %v2506_v55 = vld [vmem:[%s4295_s3 + $0x168] sm:$0xf0] }
  0xda   : > { %v3543_v42 = vadd.f32 %v556_v53, %v3386_v19  ;;  %v700_v2 = vmin.f32 %v3530_v44, 0.0  ;;  %v1078_v11 = vsel %vm1014_vm9, %v3466_v46, %v950_v4  ;;  %v1138_v16 = vmul.f32 1.050701, %v1074_v45  ;;  %v2629_v0 = vld [vmem:[%s4295_s3 + $0x64] sm:$0xf] }
  0xdb   : > { %v701_v5 = vmin.f32 %v3535_v52, 0.0  ;;  %v702_v9 = vmin.f32 %v3540_v56, 0.0  ;;  %v2737_v12 = vpop.eup %2736  ;;  %v1142_v17 = vmul.f32 1.050701, %v1078_v11  ;;  %vm1012_vm11 = vcmp.gt.f32.partialorder %v3457_v26, 0.0 }
  0xdc   : > { %v703_v10 = vmin.f32 %v3543_v42, 0.0  ;;  %v782_v20 = vmul.f32 1.442695, %v700_v2  ;;  %v951_v21 = vmul.f32 1.6732632, %v2275_v6  ;;  %v2739_v23 = vpop.eup %2738  ;;  %vm1015_vm12 = vcmp.gt.f32.partialorder %v3469_v47, 0.0 }
  0xdd   : > { %v784_v58 = vmul.f32 1.442695, %v701_v5  ;;  %v3559_v46 = vpack.c.bf16 %v1142_v17, %v1138_v16  ;;  %v2741_v27 = vpop.eup %2740  ;;  %v2272_v28 = vadd.f32 -1.0, %v2735_v59  ;;  %v786_v31 = vmul.f32 1.442695, %v702_v9 }
  0xde   : > { %v1075_v32 = vsel %vm1011_vm10, %v3440_v3, %v947_v18  ;;  %v1079_v34 = vsel %vm1015_vm12, %v3469_v47, %v951_v21  ;;  %2744 = vpow2.f32 %v780_v7  ;;  %v788_v36 = vmul.f32 1.442695, %v703_v10  ;;  %v2378_v2 = vld [vmem:[%s4295_s3 + $0x68] sm:$0xf0]  ;;  %v2677_v4 = vld [vmem:[%s4295_s3 + $0x1e4] sm:$0xf] }
  0xdf   : > { %v605_v14 = vpop.f32.mrf.mxu2  ;;  %v1139_v29 = vmul.f32 1.050701, %v1075_v32  ;;  %v1143_v61 = vmul.f32 1.050701, %v1079_v34  ;;  %v2273_v37 = vadd.f32 -1.0, %v2737_v12  ;;  %2746 = vpow2.f32 %v782_v20  ;;  %v2743_v49 = vpop.eup %2742 }
  0xe0   : > { %v654_v62 = vpop.f32.mrf.mxu3  ;;  %v510_v22 = vpop.f32.mrf.mxu0  ;;  %v3557_v25 = vadd.f32 %v605_v14, %v3408_v33  ;;  %1629 = vmatmul.bf16.gmra.mxu0 %v3559_v46  ;;  %v2276_v48 = vadd.f32 -1.0, %v2739_v23  ;;  %2748 = vpow2.f32 %v784_v58  ;;  %vm1013_vm13 = vcmp.gt.f32.partialorder %v3462_v40, 0.0  ;;  %v2570_v16 = vld [vmem:[%s4295_s3 + $0x1e8] sm:$0xf0] }
  0xe1   : > { %v559_v24 = vpop.f32.mrf.mxu1  ;;  %v3566_v39 = vadd.f32 %v654_v62, %v3410_v35  ;;  %v3569_v53 = vpack.c.bf16 %v1143_v61, %v1139_v29  ;;  %v3572_v3 = vadd.f32 %v510_v22, %v3378_v15  ;;  %v3575_v47 = vadd.f32 -1.0, %v2741_v27  ;;  %v2645_v27 = vld [vmem:[%s4295_s3 + $0xe4] sm:$0xf] }
  0xe2   : > { %v704_v50 = vmin.f32 %v3557_v25, 0.0  ;;  %2750 = vpow2.f32 %v786_v31  ;;  %v3585_v57 = vadd.f32 %v559_v24, %v3386_v19  ;;  %v948_v59 = vmul.f32 1.6732632, %v2272_v28  ;;  %v2442_v28 = vld [vmem:[%s4295_s3 + $0xe8] sm:$0xf0] }
  0xe3   : > { %2752 = vpow2.f32 %v788_v36  ;;  %1678 = vmatmul.bf16.gmra.mxu1 %v3569_v53  ;;  %v952_v60 = vmul.f32 1.6732632, %v2276_v48  ;;  %v705_v5 = vmin.f32 %v3566_v39, 0.0  ;;  %vm1016_vm14 = vcmp.gt.f32.partialorder %v3487_v1, 0.0 }
  0xe4   : > { %v2277_v45 = vadd.f32 -1.0, %v2743_v49  ;;  %v949_v6 = vmul.f32 1.6732632, %v2273_v37  ;;  %v2745_v9 = vpop.eup %2744  ;;  %v790_v10 = vmul.f32 1.442695, %v704_v50  ;;  %v706_v11 = vmin.f32 %v3572_v3, 0.0 }
  0xe5   : > { %v1076_v12 = vsel %vm1012_vm11, %v3457_v26, %v948_v59  ;;  %v1080_v14 = vsel %vm1016_vm14, %v3487_v1, %v952_v60  ;;  %v2747_v17 = vpop.eup %2746  ;;  %v707_v24 = vmin.f32 %v3585_v57, 0.0  ;;  %vm1017_vm15 = vcmp.gt.f32.partialorder %v3495_v8, 0.0 }
  0xe6   : > { %v1140_v18 = vmul.f32 1.050701, %v1076_v12  ;;  %v1144_v20 = vmul.f32 1.050701, %v1080_v14  ;;  %v953_v62 = vmul.f32 1.6732632, %v2277_v45  ;;  %v1077_v21 = vsel %vm1013_vm13, %v3462_v40, %v949_v6  ;;  %v2749_v58 = vpop.eup %2748 }
  0xe7   : > { %v608_v63 = vpop.f32.mrf.mxu2  ;;  %v2509_v26 = vor.u32 %v2661_v54, %v2506_v55  ;;  %v2381_v34 = vor.u32 %v2629_v0, %v2378_v2  ;;  %v2573_v36 = vor.u32 %v2677_v4, %v2570_v16  ;;  %v792_v61 = vmul.f32 1.442695, %v705_v5 }
  0xe8   : > { %v657_v7 = vpop.f32.mrf.mxu3  ;;  %v512_v22 = vpop.f32.mrf.mxu0  ;;  %v3612_v1 = vadd.f32 %v608_v63, %v3408_v33  ;;  %v3620_v31 = vpack.c.bf16 %v1144_v20, %v1140_v18  ;;  %v1081_v32 = vsel %vm1017_vm15, %v3495_v8, %v953_v62  ;;  %v1141_v37 = vmul.f32 1.050701, %v1077_v21 }
  0xe9   : > { %v561_v23 = vpop.f32.mrf.mxu1  ;;  %v2751_v40 = vpop.eup %2750  ;;  %v1145_v48 = vmul.f32 1.050701, %v1081_v32  ;;  %1911 = vmatpush.bf16.msra.mxu2 %v2509_v26  ;;  %v794_v49 = vmul.f32 1.442695, %v706_v11  ;;  %1813 = vmatpush.bf16.msra.mxu0 %v2381_v34  ;;  %v3626_v54 = vadd.f32 %v512_v22, %v3378_v15  ;;  %v2445_v55 = vor.u32 %v2645_v27, %v2442_v28 }
  0xea   : > { %v2753_v29 = vpop.eup %2752  ;;  %1727 = vmatmul.bf16.gmra.mxu2 %v3620_v31  ;;  %v708_v50 = vmin.f32 %v3612_v1, 0.0  ;;  %vm1018_vm0 = vcmp.gt.f32.partialorder %v3491_v41, 0.0  ;;  %v796_v8 = vmul.f32 1.442695, %v707_v24  ;;  %v3632_v60 = vadd.f32 %v657_v7, %v3410_v35  ;;  %1960 = vmatpush.bf16.msra.mxu3 %v2573_v36 }
  0xeb   : > { %v3629_v59 = vpack.c.bf16 %v1145_v48, %v1141_v37  ;;  %v2279_v63 = vadd.f32 -1.0, %v2745_v9  ;;  %vm1019_vm1 = vcmp.gt.f32.partialorder %v3525_v30, 0.0  ;;  %2754 = vpow2.f32 %v790_v10  ;;  %1862 = vmatpush.bf16.msra.mxu1 %v2445_v55  ;;  %v2659_v55 = vld [vmem:[%s4295_s3 + $0x154] sm:$0xf] }
  0xec   : > { %v3636_v0 = vadd.f32 %v561_v23, %v3386_v19  ;;  %2756 = vpow2.f32 %v792_v61  ;;  %v710_v4 = vmin.f32 %v3626_v54, 0.0  ;;  %v2282_v45 = vadd.f32 -1.0, %v2751_v40 }
  0xed   : > { %1776 = vmatmul.bf16.gmra.mxu3 %v3629_v59  ;;  %v954_v6 = vmul.f32 1.6732632, %v3575_v47  ;;  %v2280_v7 = vadd.f32 -1.0, %v2747_v17  ;;  %v2281_v11 = vadd.f32 -1.0, %v2749_v58  ;;  %2758 = vpow2.f32 %v794_v49 }
  0xee   : > { %v798_v9 = vmul.f32 1.442695, %v708_v50  ;;  %vm1020_vm2 = vcmp.gt.f32.partialorder %v3530_v44, 0.0  ;;  %2760 = vpow2.f32 %v796_v8  ;;  %v709_v10 = vmin.f32 %v3632_v60, 0.0 }
  0xef   : > { %v610_v2 = vpop.f32.mrf.mxu2  ;;  %v958_v12 = vmul.f32 1.6732632, %v2282_v45  ;;  %v1082_v14 = vsel %vm1018_vm0, %v3491_v41, %v954_v6  ;;  %v711_v16 = vmin.f32 %v3636_v0, 0.0  ;;  %vm1022_vm3 = vcmp.gt.f32.partialorder %v3540_v56, 0.0 }
  0xf0   : > { %v659_v5 = vpop.f32.mrf.mxu3  ;;  %v3648_v18 = vadd.f32 %v610_v2, %v3408_v33  ;;  %v2283_v47 = vadd.f32 -1.0, %v2753_v29  ;;  %v515_v17 = vpop.f32.mrf.mxu0  ;;  %vm1021_vm4 = vcmp.gt.f32.partialorder %v3535_v52, 0.0  ;;  %v802_v62 = vmul.f32 1.442695, %v710_v4 }
  0xf1   : > { %v564_v20 = vpop.f32.mrf.mxu1  ;;  %v3653_v21 = vadd.f32 %v659_v5, %v3410_v35  ;;  %v1086_v22 = vsel %vm1022_vm3, %v3540_v56, %v958_v12  ;;  %v955_v23 = vmul.f32 1.6732632, %v2279_v63  ;;  %v2755_v41 = vpop.eup %2754  ;;  %2762 = vpow2.f32 %v798_v9  ;;  %v2627_v12 = vld [vmem:[%s4295_s3 + $0x54] sm:$0xf] }
  0xf2   : > { %v1146_v58 = vmul.f32 1.050701, %v1082_v14  ;;  %v1150_v24 = vmul.f32 1.050701, %v1086_v22  ;;  %v959_v26 = vmul.f32 1.6732632, %v2283_v47  ;;  %v2757_v27 = vpop.eup %2756  ;;  %v3661_v40 = vadd.f32 %v515_v17, %v3378_v15 }
  0xf3   : > { %vm1023_vm5 = vcmp.gt.f32.partialorder %v3543_v42, 0.0  ;;  %v1083_v28 = vsel %vm1019_vm1, %v3525_v30, %v955_v23  ;;  %v3664_v32 = vadd.f32 %v564_v20, %v3386_v19  ;;  %v3666_v56 = vpop.eup %2758  ;;  %v804_v34 = vmul.f32 1.442695, %v711_v16  ;;  %v2675_v14 = vld [vmem:[%s4295_s3 + $0x1d4] sm:$0xf] }
  0xf4   : > { %v712_v36 = vmin.f32 %v3648_v18, 0.0  ;;  %v3669_v29 = vpack.c.bf16 %v1150_v24, %v1146_v58  ;;  %v1087_v61 = vsel %vm1023_vm5, %v3543_v42, %v959_v26  ;;  %v3672_v37 = vpop.eup %2760  ;;  %v713_v48 = vmin.f32 %v3653_v21, 0.0  ;;  %v2498_v42 = vld [vmem:[%s4295_s3 + $0x158] sm:$0xf0] }
  0xf5   : > { %v1147_v30 = vmul.f32 1.050701, %v1083_v28  ;;  %v1151_v49 = vmul.f32 1.050701, %v1087_v61  ;;  %v714_v50 = vmin.f32 %v3661_v40, 0.0  ;;  %2764 = vpow2.f32 %v802_v62 }
  0xf6   : > { %1634 = vmatmul.bf16.gmra.mxu0 %v3669_v29  ;;  %v715_v8 = vmin.f32 %v3664_v32, 0.0  ;;  %v2284_v63 = vadd.f32 -1.0, %v2755_v41  ;;  %v956_v2 = vmul.f32 1.6732632, %v2280_v7  ;;  %vm1024_vm6 = vcmp.gt.f32.partialorder %v3557_v25, 0.0 }
  0xf7   : > { %v613_v4 = vpop.f32.mrf.mxu2  ;;  %v3684_v5 = vpack.c.bf16 %v1151_v49, %v1147_v30  ;;  %v810_v45 = vmul.f32 1.442695, %v714_v50  ;;  %v2285_v6 = vadd.f32 -1.0, %v2757_v27  ;;  %v2370_v7 = vld [vmem:[%s4295_s3 + $0x58] sm:$0xf0]  ;;  %v2763_v47 = vpop.eup %2762  ;;  %vm1025_vm7 = vcmp.gt.f32.partialorder %v3566_v39, 0.0 }
  0xf8   : > { %v662_v9 = vpop.f32.mrf.mxu3  ;;  %v2562_v16 = vld [vmem:[%s4295_s3 + $0x1d8] sm:$0xf0]  ;;  %v812_v17 = vmul.f32 1.442695, %v715_v8  ;;  %v960_v20 = vmul.f32 1.6732632, %v2284_v63  ;;  %v1084_v62 = vsel %vm1020_vm2, %v3530_v44, %v956_v2  ;;  %v2501_v26 = vor.u32 %v2659_v55, %v2498_v42  ;;  %v517_v27 = vpop.f32.mrf.mxu0 }
  0xf9   : > { %v957_v22 = vmul.f32 1.6732632, %v2281_v11  ;;  %1683 = vmatmul.bf16.gmra.mxu1 %v3684_v5  ;;  %2766 = vpow2.f32 %v810_v45  ;;  %v1148_v23 = vmul.f32 1.050701, %v1084_v62  ;;  %v961_v41 = vmul.f32 1.6732632, %v2285_v6  ;;  %v566_v63 = vpop.f32.mrf.mxu1 }
  0xfa   : > { %2768 = vpow2.f32 %v812_v17  ;;  %v1088_v58 = vsel %vm1024_vm6, %v3557_v25, %v960_v20  ;;  %v3712_v61 = vadd.f32 %v613_v4, %v3408_v33  ;;  %1912 = vmatpush.bf16.msra.mxu2 %v2501_v26  ;;  %v3715_v50 = vadd.f32 %v662_v9, %v3410_v35 }
  0xfb   : > { %v1085_v24 = vsel %vm1021_vm4, %v3535_v52, %v957_v22  ;;  %v1152_v44 = vmul.f32 1.050701, %v1088_v58  ;;  %v1089_v11 = vsel %vm1025_vm7, %v3566_v39, %v961_v41  ;;  %v2765_v30 = vpop.eup %2764  ;;  %v2373_v25 = vor.u32 %v2627_v12, %v2370_v7  ;;  %v2643_v52 = vld [vmem:[%s4295_s3 + $0xd4] sm:$0xf]  ;;  %v2434_v39 = vld [vmem:[%s4295_s3 + $0xd8] sm:$0xf0] }
  0xfc   : > { %v1149_v28 = vmul.f32 1.050701, %v1085_v24  ;;  %v1153_v49 = vmul.f32 1.050701, %v1089_v11  ;;  %v2565_v8 = vor.u32 %v2675_v14, %v2562_v16  ;;  %v800_v55 = vmul.f32 1.442695, %v709_v10 }
  0xfd   : > { %v3725_v2 = vpack.c.bf16 %v1152_v44, %v1148_v23  ;;  %v716_v42 = vmin.f32 %v3712_v61, 0.0  ;;  %v3729_v4 = vadd.f32 %v517_v27, %v3378_v15  ;;  %2770 = vpow2.f32 %v804_v34  ;;  %1814 = vmatpush.bf16.msra.mxu0 %v2373_v25 }
  0xfe   : > { %v806_v45 = vmul.f32 1.442695, %v712_v36  ;;  %v3731_v6 = vpack.c.bf16 %v1153_v49, %v1149_v28  ;;  %v717_v9 = vmin.f32 %v3715_v50, 0.0  ;;  %1961 = vmatpush.bf16.msra.mxu3 %v2565_v8  ;;  %v808_v7 = vmul.f32 1.442695, %v713_v48 }
  0xff   : > { %v2767_v12 = vpop.eup %2766  ;;  %1732 = vmatmul.bf16.gmra.mxu2 %v3725_v2  ;;  %v3736_v10 = vadd.f32 %v566_v63, %v3386_v19  ;;  %v2437_v14 = vor.u32 %v2643_v52, %v2434_v39  ;;  %v814_v17 = vmul.f32 1.442695, %v716_v42  ;;  %v615_v34 = vpop.f32.mrf.mxu2  ;;  %vm1026_vm8 = vcmp.gt.f32.partialorder %v3572_v3, 0.0 }
 0x100   : > { %v2769_v16 = vpop.eup %2768  ;;  %1781 = vmatmul.bf16.gmra.mxu3 %v3731_v6  ;;  %2772 = vpow2.f32 %v800_v55  ;;  %v718_v36 = vmin.f32 %v3729_v4, 0.0  ;;  %v664_v20 = vpop.f32.mrf.mxu3  ;;  %v2286_v48 = vadd.f32 -1.0, %v3666_v56  ;;  %v2294_v62 = vadd.f32 -1.0, %v2767_v12 }
 0x101   : > { %1863 = vmatpush.bf16.msra.mxu1 %v2437_v14  ;;  %2774 = vpow2.f32 %v806_v45  ;;  %v816_v22 = vmul.f32 1.442695, %v717_v9  ;;  %vm1027_vm9 = vcmp.gt.f32.partialorder %v3585_v57, 0.0  ;;  %v719_v23 = vmin.f32 %v3736_v10, 0.0  ;;  %v520_v52 = vpop.f32.mrf.mxu0 }
 0x102   : > { %2776 = vpow2.f32 %v808_v7  ;;  %v3745_v41 = vadd.f32 %v615_v34, %v3408_v33  ;;  %v2287_v24 = vadd.f32 -1.0, %v3672_v37  ;;  %v2288_v26 = vadd.f32 -1.0, %v2763_v47 }
 0x103   : > { %v2771_v58 = vpop.eup %2770  ;;  %2778 = vpow2.f32 %v814_v17  ;;  %v3749_v27 = vadd.f32 %v664_v20, %v3410_v35  ;;  %vm1034_vm10 = vcmp.gt.f32.partialorder %v3661_v40, 0.0  ;;  %v2295_v56 = vadd.f32 -1.0, %v2769_v16 }
 0x104   : > { %v818_v44 = vmul.f32 1.442695, %v718_v36  ;;  %v2290_v11 = vadd.f32 -1.0, %v2765_v30  ;;  %v970_v28 = vmul.f32 1.6732632, %v2294_v62  ;;  %vm1035_vm11 = vcmp.gt.f32.partialorder %v3664_v32, 0.0 }
 0x105   : > { %2780 = vpow2.f32 %v816_v22  ;;  %v962_v49 = vmul.f32 1.6732632, %v2286_v48  ;;  %v820_v8 = vmul.f32 1.442695, %v719_v23  ;;  %v720_v63 = vmin.f32 %v3745_v41, 0.0  ;;  %v569_v48 = vpop.f32.mrf.mxu1 }
 0x106   : > { %v2773_v25 = vpop.eup %2772  ;;  %v966_v37 = vmul.f32 1.6732632, %v2290_v11  ;;  %v2291_v47 = vadd.f32 -1.0, %v2771_v58  ;;  %v721_v55 = vmin.f32 %v3749_v27, 0.0  ;;  %vm1030_vm12 = vcmp.gt.f32.partialorder %v3626_v54, 0.0 }
 0x107   : > { %v2775_v39 = vpop.eup %2774  ;;  %v1090_v30 = vsel %vm1026_vm8, %v3572_v3, %v962_v49  ;;  %v963_v42 = vmul.f32 1.6732632, %v2287_v24  ;;  %vm1028_vm13 = vcmp.gt.f32.partialorder %v3612_v1, 0.0  ;;  %v971_v9 = vmul.f32 1.6732632, %v2295_v56  ;;  %v618_v24 = vpop.f32.mrf.mxu2 }
 0x108   : > { %v2777_v45 = vpop.eup %2776  ;;  %2782 = vpow2.f32 %v818_v44  ;;  %v1094_v12 = vsel %vm1030_vm12, %v3626_v54, %v966_v37  ;;  %v967_v7 = vmul.f32 1.6732632, %v2291_v47  ;;  %v1154_v16 = vmul.f32 1.050701, %v1090_v30  ;;  %v2657_v58 = vld [vmem:[%s4295_s3 + $0x144] sm:$0xf] }
 0x109   : > { %v2779_v14 = vpop.eup %2778  ;;  %v1158_v17 = vmul.f32 1.050701, %v1094_v12  ;;  %vm1031_vm14 = vcmp.gt.f32.partialorder %v3636_v0, 0.0  ;;  %v3763_v34 = vadd.f32 %v520_v52, %v3378_v15  ;;  %v1098_v3 = vsel %vm1034_vm10, %v3661_v40, %v970_v28  ;;  %v2490_v40 = vld [vmem:[%s4295_s3 + $0x148] sm:$0xf0] }
 0x10a   : > { %v822_v36 = vmul.f32 1.442695, %v720_v63  ;;  %v1091_v20 = vsel %vm1027_vm9, %v3585_v57, %v963_v42  ;;  %v1095_v54 = vsel %vm1031_vm14, %v3636_v0, %v967_v7  ;;  %vm1029_vm15 = vcmp.gt.f32.partialorder %v3632_v60, 0.0 }
 0x10b   : > { %v2781_v62 = vpop.eup %2780  ;;  %v824_v22 = vmul.f32 1.442695, %v721_v55  ;;  %v3773_v23 = vpack.c.bf16 %v1158_v17, %v1154_v16  ;;  %v2296_v56 = vadd.f32 -1.0, %v2779_v14  ;;  %2784 = vpow2.f32 %v820_v8  ;;  %v2362_v14 = vld [vmem:[%s4295_s3 + $0x48] sm:$0xf0] }
 0x10c   : > { %v1155_v57 = vmul.f32 1.050701, %v1091_v20  ;;  %v1159_v0 = vmul.f32 1.050701, %v1095_v54  ;;  %v2289_v44 = vadd.f32 -1.0, %v2773_v25  ;;  %v3786_v28 = vsel %vm1035_vm11, %v3664_v32, %v971_v9  ;;  %v667_v25 = vpop.f32.mrf.mxu3  ;;  %v522_v54 = vpop.f32.mrf.mxu0 }
 0x10d   : > { %v3781_v11 = vmul.f32 1.050701, %v1098_v3  ;;  %1639 = vmatmul.bf16.gmra.mxu0 %v3773_v23  ;;  %v722_v49 = vmin.f32 %v3763_v34, 0.0  ;;  %2786 = vpow2.f32 %v822_v36  ;;  %v3793_v8 = vadd.f32 %v569_v48, %v3386_v19 }
 0x10e   : > { %v2783_v63 = vpop.eup %2782  ;;  %v3790_v37 = vpack.c.bf16 %v1159_v0, %v1155_v57  ;;  %v2292_v47 = vadd.f32 -1.0, %v2775_v39  ;;  %2788 = vpow2.f32 %v824_v22  ;;  %v964_v55 = vmul.f32 1.6732632, %v2288_v26  ;;  %v2625_v26 = vld [vmem:[%s4295_s3 + $0x44] sm:$0xf]  ;;  %v571_v57 = vpop.f32.mrf.mxu1 }
 0x10f   : > { %v826_v52 = vmul.f32 1.442695, %v722_v49  ;;  %v2493_v30 = vor.u32 %v2657_v58, %v2490_v40  ;;  %v3795_v42 = vmul.f32 1.6732632, %v2296_v56  ;;  %v2297_v32 = vadd.f32 -1.0, %v2781_v62 }
 0x110   : > { %1688 = vmatmul.bf16.gmra.mxu1 %v3790_v37  ;;  %v723_v9 = vmin.f32 %v3793_v8, 0.0  ;;  %v968_v12 = vmul.f32 1.6732632, %v2292_v47  ;;  %vm1036_vm0 = vcmp.gt.f32.partialorder %v3712_v61, 0.0  ;;  %vm1032_vm1 = vcmp.gt.f32.partialorder %v3648_v18, 0.0 }
 0x111   : > { %2790 = vpow2.f32 %v826_v52  ;;  %v1092_v39 = vsel %vm1028_vm13, %v3612_v1, %v964_v55  ;;  %v2293_v7 = vadd.f32 -1.0, %v2777_v45  ;;  %1913 = vmatpush.bf16.msra.mxu2 %v2493_v30  ;;  %v2785_v16 = vpop.eup %2784  ;;  %v2298_v17 = vadd.f32 -1.0, %v2783_v63  ;;  %v2673_v56 = vld [vmem:[%s4295_s3 + $0x1c4] sm:$0xf]  ;;  %v620_v52 = vpop.f32.mrf.mxu2 }
 0x112   : > { %v828_v3 = vmul.f32 1.442695, %v723_v9  ;;  %v1096_v36 = vsel %vm1032_vm1, %v3648_v18, %v968_v12  ;;  %v965_v20 = vmul.f32 1.6732632, %v2289_v44  ;;  %vm1037_vm2 = vcmp.gt.f32.partialorder %v3715_v50, 0.0 }
 0x113   : > { %vm1038_vm3 = vcmp.gt.f32.partialorder %v3729_v4, 0.0  ;;  %v1156_v1 = vmul.f32 1.050701, %v1092_v39  ;;  %v1160_v45 = vmul.f32 1.050701, %v1096_v36  ;;  %v3814_v62 = vadd.f32 %v618_v24, %v3408_v33  ;;  %v2787_v22 = vpop.eup %2786 }
 0x114   : > { %v969_v48 = vmul.f32 1.6732632, %v2293_v7  ;;  %vm1033_vm4 = vcmp.gt.f32.partialorder %v3653_v21, 0.0  ;;  %v1093_v58 = vsel %vm1029_vm15, %v3632_v60, %v965_v20  ;;  %v3821_v18 = vadd.f32 %v667_v25, %v3410_v35  ;;  %v2554_v24 = vld [vmem:[%s4295_s3 + $0x1c8] sm:$0xf0]  ;;  %v2789_v0 = vpop.eup %2788  ;;  %v669_v20 = vpop.f32.mrf.mxu3 }
 0x115   : > { %v2365_v40 = vor.u32 %v2625_v26, %v2362_v14  ;;  %v2299_v44 = vadd.f32 -1.0, %v2785_v16  ;;  %v3829_v49 = vpack.c.bf16 %v1160_v45, %v1156_v1  ;;  %v724_v60 = vmin.f32 %v3814_v62, 0.0  ;;  %v2641_v47 = vld [vmem:[%s4295_s3 + $0xc4] sm:$0xf]  ;;  %v2426_v25 = vld [vmem:[%s4295_s3 + $0xc8] sm:$0xf0] }
 0x116   : > { %v1097_v63 = vsel %vm1033_vm4, %v3653_v21, %v969_v48  ;;  %vm1039_vm5 = vcmp.gt.f32.partialorder %v3736_v10, 0.0  ;;  %2792 = vpow2.f32 %v828_v3  ;;  %v1157_v55 = vmul.f32 1.050701, %v1093_v58 }
 0x117   : > { %v1161_v30 = vmul.f32 1.050701, %v1097_v63  ;;  %v725_v9 = vmin.f32 %v3821_v18, 0.0  ;;  %1815 = vmatpush.bf16.msra.mxu0 %v2365_v40  ;;  %v2791_v21 = vpop.eup %2790  ;;  %1737 = vmatmul.bf16.gmra.mxu2 %v3829_v49  ;;  %v830_v12 = vmul.f32 1.442695, %v724_v60  ;;  %v2557_v39 = vor.u32 %v2673_v56, %v2554_v24  ;;  %v525_v60 = vpop.f32.mrf.mxu0 }
 0x118   : > { %v3843_v7 = vadd.f32 %v522_v54, %v3378_v15  ;;  %v3846_v26 = vadd.f32 %v571_v57, %v3386_v19  ;;  %v973_v14 = vmul.f32 1.6732632, %v2297_v32  ;;  %v974_v16 = vmul.f32 1.6732632, %v2298_v17 }
 0x119   : > { %v3848_v36 = vpack.c.bf16 %v1161_v30, %v1157_v55  ;;  %v2429_v3 = vor.u32 %v2641_v47, %v2426_v25  ;;  %v2300_v1 = vadd.f32 -1.0, %v2787_v22  ;;  %vm1040_vm6 = vcmp.gt.f32.partialorder %v3745_v41, 0.0  ;;  %1962 = vmatpush.bf16.msra.mxu3 %v2557_v39 }
 0x11a   : > { %v832_v45 = vmul.f32 1.442695, %v725_v9  ;;  %v726_v48 = vmin.f32 %v3843_v7, 0.0  ;;  %v727_v58 = vmin.f32 %v3846_v26, 0.0  ;;  %v1163_v54 = vmul.f32 1.050701, %v3786_v28 }
 0x11b   : > { %v1100_v32 = vsel %vm1036_vm0, %v3712_v61, %v3795_v42  ;;  %v2302_v17 = vadd.f32 -1.0, %v2791_v21  ;;  %1786 = vmatmul.bf16.gmra.mxu3 %v3848_v36  ;;  %1864 = vmatpush.bf16.msra.mxu1 %v2429_v3  ;;  %v3860_v22 = vadd.f32 %v620_v52, %v3408_v33  ;;  %v975_v40 = vmul.f32 1.6732632, %v2299_v44 }
 0x11c   : > { %2794 = vpow2.f32 %v830_v12  ;;  %v834_v56 = vmul.f32 1.442695, %v726_v48  ;;  %v3863_v24 = vadd.f32 %v669_v20, %v3410_v35  ;;  %v2793_v57 = vpop.eup %2792  ;;  %v1101_v28 = vsel %vm1037_vm2, %v3715_v50, %v973_v14  ;;  %v574_v50 = vpop.f32.mrf.mxu1 }
 0x11d   : > { %v2301_v63 = vadd.f32 -1.0, %v2789_v0  ;;  %v728_v61 = vmin.f32 %v3860_v22, 0.0  ;;  %v1102_v42 = vsel %vm1038_vm3, %v3729_v4, %v974_v16  ;;  %v1164_v47 = vmul.f32 1.050701, %v1100_v32  ;;  %v623_v12 = vpop.f32.mrf.mxu2  ;;  %v672_v32 = vpop.f32.mrf.mxu3 }
 0x11e   : > { %v976_v44 = vmul.f32 1.6732632, %v2300_v1  ;;  %2796 = vpow2.f32 %v832_v45  ;;  %v836_v25 = vmul.f32 1.442695, %v727_v58  ;;  %vm1041_vm7 = vcmp.gt.f32.partialorder %v3749_v27, 0.0 }
 0x11f   : > { %v978_v52 = vmul.f32 1.6732632, %v2302_v17  ;;  %2798 = vpow2.f32 %v834_v56  ;;  %v729_v55 = vmin.f32 %v3863_v24, 0.0  ;;  %v1166_v30 = vmul.f32 1.050701, %v1102_v42 }
 0x120   : > { %v3874_v0 = vmul.f32 1.050701, %v1101_v28  ;;  %v838_v9 = vmul.f32 1.442695, %v728_v61  ;;  %v1103_v4 = vsel %vm1039_vm5, %v3736_v10, %v975_v40  ;;  %v3880_v21 = vadd.f32 %v525_v60, %v3378_v15  ;;  %v2655_v58 = vld [vmem:[%s4295_s3 + $0x134] sm:$0xf] }
 0x121   : > { %v977_v39 = vmul.f32 1.6732632, %v2301_v63  ;;  %vm1042_vm8 = vcmp.gt.f32.partialorder %v3763_v34, 0.0  ;;  %v2303_v14 = vadd.f32 -1.0, %v2793_v57  ;;  %v3884_v16 = vpack.c.bf16 %v1166_v30, %v3781_v11  ;;  %v2482_v57 = vld [vmem:[%s4295_s3 + $0x138] sm:$0xf0] }
 0x122   : > { %v2795_v3 = vpop.eup %2794  ;;  %vm1043_vm9 = vcmp.gt.f32.partialorder %v3793_v8, 0.0  ;;  %2800 = vpow2.f32 %v836_v25  ;;  %v1167_v20 = vmul.f32 1.050701, %v1103_v4  ;;  %v730_v1 = vmin.f32 %v3880_v21, 0.0  ;;  %v2623_v42 = vld [vmem:[%s4295_s3 + $0x34] sm:$0xf] }
 0x123   : > { %v1106_v10 = vsel %vm1042_vm8, %v3763_v34, %v978_v52  ;;  %v840_v45 = vmul.f32 1.442695, %v729_v55  ;;  %1644 = vmatmul.bf16.gmra.mxu0 %v3884_v16  ;;  %v3891_v48 = vadd.f32 %v574_v50, %v3386_v19  ;;  %v1104_v11 = vsel %vm1040_vm6, %v3745_v41, %v976_v44  ;;  %v2671_v44 = vld [vmem:[%s4295_s3 + $0x1b4] sm:$0xf]  ;;  %v2546_v30 = vld [vmem:[%s4295_s3 + $0x1b8] sm:$0xf0]  ;;  %v527_v50 = vpop.f32.mrf.mxu0 }
 0x124   : > { %v2797_v17 = vpop.eup %2796  ;;  %2802 = vpow2.f32 %v838_v9  ;;  %v3899_v40 = vpack.c.bf16 %v1167_v20, %v1163_v54  ;;  %v842_v34 = vmul.f32 1.442695, %v730_v1  ;;  %v1168_v56 = vmul.f32 1.050701, %v1104_v11  ;;  %v2354_v54 = vld [vmem:[%s4295_s3 + $0x38] sm:$0xf0]  ;;  %v576_v11 = vpop.f32.mrf.mxu1 }
 0x125   : > { %v2799_v28 = vpop.eup %2798  ;;  %v979_v63 = vmul.f32 1.6732632, %v2303_v14  ;;  %v2304_v61 = vadd.f32 -1.0, %v2795_v3  ;;  %v731_v41 = vmin.f32 %v3891_v48, 0.0  ;;  %v3908_v60 = vmul.f32 1.050701, %v1106_v10 }
 0x126   : > { %vm1044_vm10 = vcmp.gt.f32.partialorder %v3814_v62, 0.0  ;;  %1693 = vmatmul.bf16.gmra.mxu1 %v3899_v40  ;;  %2804 = vpow2.f32 %v842_v34  ;;  %v2305_v25 = vadd.f32 -1.0, %v2797_v17  ;;  %vm1045_vm11 = vcmp.gt.f32.partialorder %v3821_v18, 0.0  ;;  %v2418_v17 = vld [vmem:[%s4295_s3 + $0xb8] sm:$0xf0]  ;;  %v625_v34 = vpop.f32.mrf.mxu2 }
 0x127   : > { %v844_v52 = vmul.f32 1.442695, %v731_v41  ;;  %v3919_v55 = vpack.c.bf16 %v1168_v56, %v1164_v47  ;;  %v2306_v4 = vadd.f32 -1.0, %v2799_v28  ;;  %2806 = vpow2.f32 %v840_v45 }
 0x128   : > { %v2801_v9 = vpop.eup %2800  ;;  %v1105_v14 = vsel %vm1041_vm7, %v3749_v27, %v977_v39  ;;  %v2485_v3 = vor.u32 %v2655_v58, %v2482_v57  ;;  %v1107_v20 = vsel %vm1043_vm9, %v3793_v8, %v979_v63  ;;  %v980_v1 = vmul.f32 1.6732632, %v2304_v61  ;;  %v2639_v8 = vld [vmem:[%s4295_s3 + $0xb4] sm:$0xf] }
 0x129   : > { %vm1046_vm12 = vcmp.gt.f32.partialorder %v3843_v7, 0.0  ;;  %1742 = vmatmul.bf16.gmra.mxu2 %v3919_v55  ;;  %v1169_v47 = vmul.f32 1.050701, %v1105_v14  ;;  %v3933_v10 = vadd.f32 %v623_v12, %v3408_v33  ;;  %2808 = vpow2.f32 %v844_v52  ;;  %v674_v52 = vpop.f32.mrf.mxu3 }
 0x12a   : > { %v2803_v45 = vpop.eup %2802  ;;  %1914 = vmatpush.bf16.msra.mxu2 %v2485_v3  ;;  %v3936_v27 = vadd.f32 %v672_v32, %v3410_v35  ;;  %v2357_v39 = vor.u32 %v2623_v42, %v2354_v54  ;;  %v2549_v58 = vor.u32 %v2671_v44, %v2546_v30  ;;  %v981_v12 = vmul.f32 1.6732632, %v2305_v25 }
 0x12b   : > { %v2307_v56 = vadd.f32 -1.0, %v2801_v9  ;;  %vm1047_vm13 = vcmp.gt.f32.partialorder %v3846_v26, 0.0  ;;  %v3946_v57 = vpack.c.bf16 %v1169_v47, %v3874_v0  ;;  %v732_v32 = vmin.f32 %v3933_v10, 0.0 }
 0x12c   : > { %v2805_v28 = vpop.eup %2804  ;;  %v982_v63 = vmul.f32 1.6732632, %v2306_v4  ;;  %v733_v61 = vmin.f32 %v3936_v27, 0.0  ;;  %1816 = vmatpush.bf16.msra.mxu0 %v2357_v39  ;;  %1963 = vmatpush.bf16.msra.mxu3 %v2549_v58  ;;  %v3951_v41 = vadd.f32 %v527_v50, %v3378_v15  ;;  %v3954_v42 = vadd.f32 %v576_v11, %v3386_v19 }
 0x12d   : > { %v2308_v54 = vadd.f32 -1.0, %v2803_v45  ;;  %1791 = vmatmul.bf16.gmra.mxu3 %v3946_v57  ;;  %v846_v44 = vmul.f32 1.442695, %v732_v32  ;;  %v2421_v0 = vor.u32 %v2639_v8, %v2418_v17  ;;  %v3958_v25 = vadd.f32 %v625_v34, %v3408_v33  ;;  %v2807_v30 = vpop.eup %2806 }
 0x12e   : > { %vm1048_vm14 = vcmp.gt.f32.partialorder %v3860_v22, 0.0  ;;  %v2310_v9 = vadd.f32 -1.0, %v2805_v28  ;;  %v848_v4 = vmul.f32 1.442695, %v733_v61  ;;  %v734_v50 = vmin.f32 %v3951_v41, 0.0 }
 0x12f   : > { %v735_v14 = vmin.f32 %v3954_v42, 0.0  ;;  %v1171_v3 = vmul.f32 1.050701, %v1107_v20  ;;  %v1108_v47 = vsel %vm1044_vm10, %v3814_v62, %v980_v1  ;;  %2810 = vpow2.f32 %v846_v44  ;;  %1865 = vmatpush.bf16.msra.mxu1 %v2421_v0  ;;  %v2809_v45 = vpop.eup %2808  ;;  %v530_v62 = vpop.f32.mrf.mxu0 }
 0x130   : > { %v736_v11 = vmin.f32 %v3958_v25, 0.0  ;;  %v1109_v39 = vsel %vm1045_vm11, %v3821_v18, %v981_v12  ;;  %v983_v58 = vmul.f32 1.6732632, %v2307_v56  ;;  %v850_v8 = vmul.f32 1.442695, %v734_v50  ;;  %v579_v44 = vpop.f32.mrf.mxu1 }
 0x131   : > { %v852_v17 = vmul.f32 1.442695, %v735_v14  ;;  %v2309_v34 = vadd.f32 -1.0, %v2807_v30  ;;  %vm1049_vm15 = vcmp.gt.f32.partialorder %v3863_v24, 0.0  ;;  %2812 = vpow2.f32 %v848_v4 }
 0x132   : > { %v854_v20 = vmul.f32 1.442695, %v736_v11  ;;  %v3972_v32 = vadd.f32 %v674_v52, %v3410_v35  ;;  %v984_v1 = vmul.f32 1.6732632, %v2308_v54  ;;  %v986_v28 = vmul.f32 1.6732632, %v2310_v9 }
 0x133   : > { %2814 = vpow2.f32 %v850_v8  ;;  %v1110_v61 = vsel %vm1046_vm12, %v3843_v7, %v982_v63  ;;  %v2311_v18 = vadd.f32 -1.0, %v2809_v45  ;;  %v1172_v0 = vmul.f32 1.050701, %v1108_v47  ;;  %v628_v8 = vpop.f32.mrf.mxu2 }
 0x134   : > { %2816 = vpow2.f32 %v852_v17  ;;  %v737_v12 = vmin.f32 %v3972_v32, 0.0  ;;  %v1174_v56 = vmul.f32 1.050701, %v1110_v61  ;;  %vm1050_vm0 = vcmp.gt.f32.partialorder %v3880_v21, 0.0 }
 0x135   : > { %v1111_v52 = vsel %vm1047_vm13, %v3846_v26, %v983_v58  ;;  %v3983_v54 = vadd.f32 %v530_v62, %v3378_v15  ;;  %v2811_v30 = vpop.eup %2810  ;;  %2818 = vpow2.f32 %v854_v20  ;;  %v1173_v4 = vmul.f32 1.050701, %v1109_v39  ;;  %v677_v39 = vpop.f32.mrf.mxu3 }
 0x136   : > { %v856_v9 = vmul.f32 1.442695, %v737_v12  ;;  %v3986_v7 = vpack.c.bf16 %v1174_v56, %v3908_v60  ;;  %v1175_v63 = vmul.f32 1.050701, %v1111_v52  ;;  %v985_v50 = vmul.f32 1.6732632, %v2309_v34 }
 0x137   : > { %v738_v14 = vmin.f32 %v3983_v54, 0.0  ;;  %v3990_v47 = vadd.f32 %v579_v44, %v3386_v19  ;;  %v2813_v11 = vpop.eup %2812  ;;  %v1114_v26 = vsel %vm1050_vm0, %v3880_v21, %v986_v28  ;;  %v987_v45 = vmul.f32 1.6732632, %v2311_v18  ;;  %v2653_v21 = vld [vmem:[%s4295_s3 + $0x124] sm:$0xf] }
 0x138   : > { %4302 = vst [vmem:[#allocation8_spill] sm:$0xff] %v3986_v7  ;;  %1649 = vmatmul.bf16.gmra.mxu0 %v3986_v7  ;;  %v3994_v58 = vpack.c.bf16 %v1175_v63, %v1171_v3  ;;  %v1112_v60 = vsel %vm1048_vm14, %v3860_v22, %v984_v1  ;;  %vm1051_vm1 = vcmp.gt.f32.partialorder %v3891_v48, 0.0  ;;  %v2312_v34 = vadd.f32 -1.0, %v2811_v30  ;;  %v2474_v1 = vld [vmem:[%s4295_s3 + $0x128] sm:$0xf0] }
 0x139   : > { %v2815_v17 = vpop.eup %2814  ;;  %v858_v20 = vmul.f32 1.442695, %v738_v14  ;;  %vm1052_vm2 = vcmp.gt.f32.partialorder %v3933_v10, 0.0  ;;  %2820 = vpow2.f32 %v856_v9  ;;  %v739_v3 = vmin.f32 %v3990_v47, 0.0  ;;  %v2621_v18 = vld [vmem:[%s4295_s3 + $0x24] sm:$0xf] }
 0x13a   : > { %4303 = vst [vmem:[#allocation9_spill] sm:$0xff] %v3994_v58  ;;  %v2817_v62 = vpop.eup %2816  ;;  %1698 = vmatmul.bf16.gmra.mxu1 %v3994_v58  ;;  %v1176_v22 = vmul.f32 1.050701, %v1112_v60  ;;  %v4009_v28 = vmul.f32 1.050701, %v1114_v26  ;;  %v1113_v61 = vsel %vm1049_vm15, %v3863_v24, %v985_v50  ;;  %v1115_v44 = vsel %vm1051_vm1, %v3891_v48, %v987_v45  ;;  %v532_v26 = vpop.f32.mrf.mxu0 }
 0x13b   : > { %2822 = vpow2.f32 %v858_v20  ;;  %v2346_v12 = vld [vmem:[%s4295_s3 + $0x28] sm:$0xf0]  ;;  %v2819_v56 = vpop.eup %2818  ;;  %v2313_v52 = vadd.f32 -1.0, %v2813_v11  ;;  %vm1053_vm3 = vcmp.gt.f32.partialorder %v3936_v27, 0.0  ;;  %v2669_v24 = vld [vmem:[%s4295_s3 + $0x1a4] sm:$0xf]  ;;  %v2477_v45 = vor.u32 %v2653_v21, %v2474_v1  ;;  %v581_v20 = vpop.f32.mrf.mxu1 }
 0x13c   : > { %v2538_v30 = vld [vmem:[%s4295_s3 + $0x1a8] sm:$0xf0]  ;;  %v988_v9 = vmul.f32 1.6732632, %v2312_v34  ;;  %v2314_v63 = vadd.f32 -1.0, %v2815_v17  ;;  %vm1054_vm4 = vcmp.gt.f32.partialorder %v3951_v41, 0.0  ;;  %v4031_v14 = vpack.c.bf16 %v1176_v22, %v1172_v0 }
 0x13d   : > { %v2315_v50 = vadd.f32 -1.0, %v2817_v62  ;;  %v860_v48 = vmul.f32 1.442695, %v739_v3  ;;  %v1177_v11 = vmul.f32 1.050701, %v1113_v61  ;;  %v4034_v60 = vadd.f32 %v628_v8, %v3408_v33  ;;  %1915 = vmatpush.bf16.msra.mxu2 %v2477_v45 }
 0x13e   : > { %v2316_v58 = vadd.f32 -1.0, %v2819_v56  ;;  %1747 = vmatmul.bf16.gmra.mxu2 %v4031_v14  ;;  %v4038_v7 = vadd.f32 %v677_v39, %v3410_v35  ;;  %v2349_v17 = vor.u32 %v2621_v18, %v2346_v12  ;;  %v2541_v34 = vor.u32 %v2669_v24, %v2538_v30  ;;  %v2637_v0 = vld [vmem:[%s4295_s3 + $0xa4] sm:$0xf]  ;;  %v2410_v22 = vld [vmem:[%s4295_s3 + $0xa8] sm:$0xf0]  ;;  %v630_v24 = vpop.f32.mrf.mxu2  ;;  %v679_v30 = vpop.f32.mrf.mxu3 }
 0x13f   : > { %v2821_v62 = vpop.eup %2820  ;;  %v989_v3 = vmul.f32 1.6732632, %v2313_v52  ;;  %vm1055_vm5 = vcmp.gt.f32.partialorder %v3954_v42, 0.0  ;;  %vm1056_vm6 = vcmp.gt.f32.partialorder %v3958_v25, 0.0  ;;  %v4045_v8 = vpack.c.bf16 %v1177_v11, %v1173_v4 }
 0x140   : > { %v740_v21 = vmin.f32 %v4034_v60, 0.0  ;;  %v4049_v39 = vadd.f32 %v532_v26, %v3378_v15  ;;  %v1116_v61 = vsel %vm1052_vm2, %v3933_v10, %v988_v9  ;;  %v990_v18 = vmul.f32 1.6732632, %v2314_v63  ;;  %1817 = vmatpush.bf16.msra.mxu0 %v2349_v17  ;;  %1964 = vmatpush.bf16.msra.mxu3 %v2541_v34 }
 0x141   : > { %v2823_v1 = vpop.eup %2822  ;;  %v741_v12 = vmin.f32 %v4038_v7, 0.0  ;;  %v4059_v4 = vadd.f32 %v581_v20, %v3386_v19  ;;  %v991_v56 = vmul.f32 1.6732632, %v2315_v50  ;;  %vm1057_vm7 = vcmp.gt.f32.partialorder %v3972_v32, 0.0  ;;  %1796 = vmatmul.bf16.gmra.mxu3 %v4045_v8 }
 0x142   : > { %2824 = vpow2.f32 %v860_v48  ;;  %v862_v15 = vmul.f32 1.442695, %v740_v21  ;;  %v742_v52 = vmin.f32 %v4049_v39, 0.0  ;;  %v992_v10 = vmul.f32 1.6732632, %v2316_v58 }
 0x143   : > { %v2317_v9 = vadd.f32 -1.0, %v2821_v62  ;;  %v743_v63 = vmin.f32 %v4059_v4, 0.0  ;;  %v2413_v26 = vor.u32 %v2637_v0, %v2410_v22  ;;  %v1117_v19 = vsel %vm1053_vm3, %v3936_v27, %v989_v3  ;;  %v2651_v27 = vld [vmem:[%s4295_s3 + $0x114] sm:$0xf]  ;;  %v2466_v0 = vld [vmem:[%s4295_s3 + $0x118] sm:$0xf0] }
 0x144   : > { %v2318_v50 = vadd.f32 -1.0, %v2823_v1  ;;  %v864_v11 = vmul.f32 1.442695, %v741_v12  ;;  %v866_v45 = vmul.f32 1.442695, %v742_v52  ;;  %2826 = vpow2.f32 %v862_v15 }
 0x145   : > { %v868_v48 = vmul.f32 1.442695, %v743_v63  ;;  %1866 = vmatpush.bf16.msra.mxu1 %v2413_v26  ;;  %v4069_v20 = vadd.f32 %v630_v24, %v3408_v33  ;;  %v4072_v17 = vadd.f32 %v679_v30, %v3410_v35  ;;  %v1179_v58 = vmul.f32 1.050701, %v1115_v44  ;;  %v2338_v1 = vld [vmem:[%s4295_s3 + $0x18] sm:$0xf0] }
 0x146   : > { %2828 = vpow2.f32 %v866_v45  ;;  %v1118_v34 = vsel %vm1054_vm4, %v3951_v41, %v990_v18  ;;  %v1180_v62 = vmul.f32 1.050701, %v1116_v61  ;;  %v993_v33 = vmul.f32 1.6732632, %v2317_v9  ;;  %v2619_v41 = vld [vmem:[%s4295_s3 + $0x14] sm:$0xf] }
 0x147   : > { %2830 = vpow2.f32 %v868_v48  ;;  %v744_v35 = vmin.f32 %v4069_v20, 0.0  ;;  %v1181_v44 = vmul.f32 1.050701, %v1117_v19  ;;  %v745_v21 = vmin.f32 %v4072_v17, 0.0  ;;  %v2667_v52 = vld [vmem:[%s4295_s3 + $0x194] sm:$0xf] }
 0x148   : > { %v2825_v3 = vpop.eup %2824  ;;  %2832 = vpow2.f32 %v864_v11  ;;  %v1182_v22 = vmul.f32 1.050701, %v1118_v34  ;;  %v994_v18 = vmul.f32 1.6732632, %v2318_v50  ;;  %v1119_v12 = vsel %vm1055_vm5, %v3954_v42, %v991_v56  ;;  %v2530_v24 = vld [vmem:[%s4295_s3 + $0x198] sm:$0xf0] }
 0x149   : > { %v870_v61 = vmul.f32 1.442695, %v744_v35  ;;  %v1120_v15 = vsel %vm1056_vm6, %v3958_v25, %v992_v10  ;;  %v2635_v30 = vld [vmem:[%s4295_s3 + $0x94] sm:$0xf]  ;;  %v2402_v42 = vld [vmem:[%s4295_s3 + $0x98] sm:$0xf0]  ;;  %v1121_v19 = vsel %vm1057_vm7, %v3972_v32, %v993_v33  ;;  %v2469_v50 = vor.u32 %v2651_v27, %v2466_v0 }
 0x14a   : > { %v872_v56 = vmul.f32 1.442695, %v745_v21  ;;  %v4110_v9 = vpack.c.bf16 %v1182_v22, %v4009_v28  ;;  %v1183_v25 = vmul.f32 1.050701, %v1119_v12  ;;  %v1184_v10 = vmul.f32 1.050701, %v1120_v15  ;;  %v2827_v63 = vpop.eup %2826 }
 0x14b   : > { %v2319_v26 = vadd.f32 -1.0, %v2825_v3  ;;  %2834 = vpow2.f32 %v870_v61  ;;  %v2649_v11 = vld [vmem:[%s4295_s3 + $0x104] sm:$0xf]  ;;  %v2458_v45 = vld [vmem:[%s4295_s3 + $0x108] sm:$0xf0]  ;;  %vm1058_vm8 = vcmp.gt.f32.partialorder %v3983_v54, 0.0  ;;  %1916 = vmatpush.bf16.msra.mxu2 %v2469_v50  ;;  %v2533_v12 = vor.u32 %v2667_v52, %v2530_v24 }
 0x14c   : > { %v2829_v28 = vpop.eup %2828  ;;  %2836 = vpow2.f32 %v872_v56  ;;  %1654 = vmatmul.bf16.gmra.mxu0 %v4110_v9  ;;  %v4122_v48 = vpack.c.bf16 %v1183_v25, %v1179_v58  ;;  %v4124_v34 = vpack.c.bf16 %v1184_v10, %v1180_v62  ;;  %v2617_v32 = vld [vmem:[%s4295_s3 + $0x4] sm:$0xf]  ;;  %v2330_v27 = vld [vmem:[%s4295_s3 + $0x8] sm:$0xf0]  ;;  %v1185_v58 = vmul.f32 1.050701, %v1121_v19 }
 0x14d   : > { %v2665_v0 = vld [vmem:[%s4295_s3 + $0x184] sm:$0xf]  ;;  %v2831_v33 = vpop.eup %2830  ;;  %v2322_v35 = vadd.f32 -1.0, %v2829_v28  ;;  %v2341_v62 = vor.u32 %v2619_v41, %v2338_v1  ;;  %v2522_v3 = vld [vmem:[%s4295_s3 + $0x188] sm:$0xf0]  ;;  %v2320_v22 = vadd.f32 -1.0, %v2827_v63  ;;  %v2405_v15 = vor.u32 %v2635_v30, %v2402_v42  ;;  %1965 = vmatpush.bf16.msra.mxu3 %v2533_v12  ;;  %v1625_v19 = vpop.f32.mrf.mxu0 }
 0x14e   : > { %v2833_v21 = vpop.eup %2832  ;;  %v2323_v61 = vadd.f32 -1.0, %v2831_v33  ;;  %1703 = vmatmul.bf16.gmra.mxu1 %v4122_v48  ;;  %v2633_v56 = vld [vmem:[%s4295_s3 + $0x84] sm:$0xf]  ;;  %v2394_v25 = vld [vmem:[%s4295_s3 + $0x88] sm:$0xf0]  ;;  %vm1062_vm9 = vcmp.gt.f32.partialorder %v4049_v39, 0.0  ;;  %1752 = vmatmul.bf16.gmra.mxu2 %v4124_v34  ;;  %v4148_v1 = vpack.c.bf16 %v1185_v58, %v1181_v44  ;;  %v2461_v10 = vor.u32 %v2649_v11, %v2458_v45 }
 0x14f   : > { %v998_v41 = vmul.f32 1.6732632, %v2322_v35  ;;  %1818 = vmatpush.bf16.msra.mxu0 %v2341_v62  ;;  %v4150_v63 = vld [vmem:[#allocation4] sm:$0x3]  ;;  %v1122_v52 = vsel %vm1058_vm8, %v3983_v54, %v994_v18  ;;  %v995_v24 = vmul.f32 1.6732632, %v2319_v26  ;;  %1867 = vmatpush.bf16.msra.mxu1 %v2405_v15  ;;  %v2333_v42 = vor.u32 %v2617_v32, %v2330_v27 }
 0x150   : > { %v999_v30 = vmul.f32 1.6732632, %v2323_v61  ;;  %v2321_v28 = vadd.f32 -1.0, %v2833_v21  ;;  %1917 = vmatpush.bf16.msra.mxu2 %v2461_v10  ;;  %v2525_v44 = vor.u32 %v2665_v0, %v2522_v3  ;;  %v2397_v35 = vor.u32 %v2633_v56, %v2394_v25  ;;  %v1674_v0 = vpop.f32.mrf.mxu1 }
 0x151   : > { %v2835_v50 = vpop.eup %2834  ;;  %v1126_v33 = vsel %vm1062_vm9, %v4049_v39, %v998_v41  ;;  %v996_v45 = vmul.f32 1.6732632, %v2320_v22  ;;  %vm1063_vm10 = vcmp.gt.f32.partialorder %v4059_v4, 0.0  ;;  %1801 = vmatmul.bf16.gmra.mxu3 %v4148_v1  ;;  %v4159_v54 = vperm.slane %v4150_v63, 0 }
 0x152   : > { %v2837_v11 = vpop.eup %2836  ;;  %v2324_v58 = vadd.f32 -1.0, %v2835_v50  ;;  %v1186_v18 = vmul.f32 1.050701, %v1122_v52  ;;  %vm1059_vm11 = vcmp.gt.f32.partialorder %v3990_v47, 0.0  ;;  %v1127_v32 = vsel %vm1063_vm10, %v4059_v4, %v999_v30  ;;  %1966 = vmatpush.bf16.msra.mxu3 %v2525_v44 }
 0x153   : > { %v2325_v26 = vadd.f32 -1.0, %v2837_v11  ;;  %1819 = vmatpush.bf16.msra.mxu0 %v2333_v42  ;;  %vm1060_vm12 = vcmp.gt.f32.partialorder %v4034_v60, 0.0  ;;  %vm1064_vm13 = vcmp.gt.f32.partialorder %v4069_v20, 0.0  ;;  %v1190_v27 = vmul.f32 1.050701, %v1126_v33  ;;  %1868 = vmatpush.bf16.msra.mxu1 %v2397_v35 }
 0x154   : > { %v1000_v39 = vmul.f32 1.6732632, %v2324_v58  ;;  %v1123_v62 = vsel %vm1059_vm11, %v3990_v47, %v995_v24  ;;  %v997_v3 = vmul.f32 1.6732632, %v2321_v28  ;;  %v1626_v22 = vadd.f32 %v1625_v19, %v4159_v54 }
 0x155   : > { %v1001_v21 = vmul.f32 1.6732632, %v2325_v26  ;;  %v1124_v61 = vsel %vm1060_vm12, %v4034_v60, %v996_v45  ;;  %vm1065_vm14 = vcmp.gt.f32.partialorder %v4072_v17, 0.0  ;;  %v1191_v4 = vmul.f32 1.050701, %v1127_v32  ;;  %v1627_v30 = vpop.f32.mrf.mxu0 }
 0x156   : > { %v1128_v12 = vsel %vm1064_vm13, %v4069_v20, %v1000_v39  ;;  %v1187_v25 = vmul.f32 1.050701, %v1123_v62  ;;  %vm1061_vm15 = vcmp.gt.f32.partialorder %v4038_v7, 0.0  ;;  %v4172_v41 = vpack.c.bf16 %v1190_v27, %v1186_v18 }
 0x157   : > { %v1192_v15 = vmul.f32 1.050701, %v1128_v12  ;;  %v1129_v56 = vsel %vm1065_vm14, %v4072_v17, %v1001_v21  ;;  %v1188_v47 = vmul.f32 1.050701, %v1124_v61  ;;  %v1125_v10 = vsel %vm1061_vm15, %v4038_v7, %v997_v3 }
 0x158   : > { %v1675_v52 = vadd.f32 %v1674_v0, %v1626_v22  ;;  %v4176_v24 = vpack.c.bf16 %v1191_v4, %v1187_v25  ;;  %v1193_v60 = vmul.f32 1.050701, %v1129_v56  ;;  %v1189_v17 = vmul.f32 1.050701, %v1125_v10  ;;  %v1676_v44 = vpop.f32.mrf.mxu1 }
 0x159   : > { %v4178_v19 = vpack.c.bf16 %v1192_v15, %v1188_v47  ;;  %v1628_v7 = vadd.f32 %v1627_v30, %v4159_v54 }
 0x15a   : > { %v1723_v42 = vpop.f32.mrf.mxu2  ;;  %v4188_v33 = vpack.c.bf16 %v1193_v60, %v1189_v17 }
 0x15b   : > { %v1724_v20 = vadd.f32 %v1723_v42, %v1675_v52  ;;  %v1772_v50 = vpop.f32.mrf.mxu3  ;;  %v1677_v35 = vadd.f32 %v1676_v44, %v1628_v7 }
 0x15c   : > { %1659 = vmatmul.bf16.gmra.mxu0 %v4172_v41 }
 0x15d   : > { %v1773_v28 = vadd.f32 %v1772_v50, %v1724_v20  ;;  %v1630_v58 = vpop.f32.mrf.mxu0 }
 0x15e   : > { %1708 = vmatmul.bf16.gmra.mxu1 %v4176_v24  ;;  %1757 = vmatmul.bf16.gmra.mxu2 %v4178_v19  ;;  %v1631_v39 = vadd.f32 %v1630_v58, %v4159_v54 }
 0x15f   : > { %2008 = vst [vmem:[%s4183_s13] sm:$0xff] %v1773_v28 }
 0x160   : > { %v1679_v32 = vpop.f32.mrf.mxu1 }
 0x161   : > { %1806 = vmatmul.bf16.gmra.mxu3 %v4188_v33  ;;  %v1680_v27 = vadd.f32 %v1679_v32, %v1631_v39 }
 0x162   : > { %v1725_v11 = vpop.f32.mrf.mxu2 }
 0x163   : > { %v1726_v45 = vadd.f32 %v1725_v11, %v1677_v35  ;;  %v1774_v18 = vpop.f32.mrf.mxu3 }
 0x165   : > { %v1775_v26 = vadd.f32 %v1774_v18, %v1726_v45  ;;  %v1632_v0 = vpop.f32.mrf.mxu0 }
 0x166   : > { %v1633_v21 = vadd.f32 %v1632_v0, %v4159_v54 }
 0x167   : > { %2010 = vst [vmem:[%s4183_s13 + $0x10] sm:$0xff] %v1775_v26 }
 0x168   : > { %v1681_v61 = vpop.f32.mrf.mxu1 }
 0x169   : > { %v1682_v12 = vadd.f32 %v1681_v61, %v1633_v21 }
 0x16c   : > { %1820 = vmatmul.bf16.vlgmr.msra.gmra.mxu0 %v3483_v38 }
 0x16d   : > { %v1728_v62 = vpop.f32.mrf.mxu2 }
 0x16e   : > { %1869 = vmatmul.bf16.vlgmr.msra.gmra.mxu1 %v3505_v13  ;;  %1918 = vmatmul.bf16.vlgmr.msra.gmra.mxu2 %v3527_v43  ;;  %v1729_v3 = vadd.f32 %v1728_v62, %v1680_v27 }
 0x170   : > { %v1777_v22 = vpop.f32.mrf.mxu3 }
 0x171   : > { %1967 = vmatmul.bf16.vlgmr.msra.gmra.mxu3 %v3532_v51  ;;  %v1778_v4 = vadd.f32 %v1777_v22, %v1729_v3 }
 0x173   : > { %2012 = vst [vmem:[%s4183_s13 + $0x20] sm:$0xff] %v1778_v4  ;;  %v1635_v56 = vpop.f32.mrf.mxu0 }
 0x174   : > { %v1636_v47 = vadd.f32 %v1635_v56, %v4159_v54 }
 0x175   : > { %v1730_v15 = vpop.f32.mrf.mxu2 }
 0x176   : > { %v1731_v38 = vadd.f32 %v1730_v15, %v1682_v12  ;;  %v1684_v43 = vpop.f32.mrf.mxu1 }
 0x177   : > { %v1685_v51 = vadd.f32 %v1684_v43, %v1636_v47  ;;  %v4305_v43 = vld [vmem:[#allocation9_spill] sm:$0xff] }
 0x178   : > { %v1779_v25 = vpop.f32.mrf.mxu3 }
 0x179   : > { %v1780_v13 = vadd.f32 %v1779_v25, %v1731_v38 }
 0x17b   : > { %2014 = vst [vmem:[%s4183_s13 + $0x30] sm:$0xff] %v1780_v13  ;;  %v1637_v10 = vpop.f32.mrf.mxu0 }
 0x17c   : > { %1825 = vmatmul.bf16.gmra.mxu0 %v3559_v46  ;;  %v1638_v42 = vadd.f32 %v1637_v10, %v4159_v54 }
 0x17e   : > { %1874 = vmatmul.bf16.gmra.mxu1 %v3569_v53  ;;  %1923 = vmatmul.bf16.gmra.mxu2 %v3620_v31  ;;  %v1686_v20 = vpop.f32.mrf.mxu1 }
 0x17f   : > { %v1687_v50 = vadd.f32 %v1686_v20, %v1638_v42 }
 0x181   : > { %1972 = vmatmul.bf16.gmra.mxu3 %v3629_v59 }
 0x182   : > { %v1733_v52 = vpop.f32.mrf.mxu2 }
 0x183   : > { %v1734_v60 = vadd.f32 %v1733_v52, %v1685_v51  ;;  %v1782_v30 = vpop.f32.mrf.mxu3 }
 0x185   : > { %v1783_v46 = vadd.f32 %v1782_v30, %v1734_v60 }
 0x187   : > { %2016 = vst [vmem:[%s4183_s13 + $0x40] sm:$0xff] %v1783_v46 }
 0x18a   : > { %v1735_v17 = vpop.f32.mrf.mxu2  ;;  %v1640_v7 = vpop.f32.mrf.mxu0 }
 0x18b   : > { %v1736_v53 = vadd.f32 %v1735_v17, %v1687_v50  ;;  %v1784_v31 = vpop.f32.mrf.mxu3  ;;  %v1641_v44 = vadd.f32 %v1640_v7, %v4159_v54 }
 0x18c   : > { %1830 = vmatmul.bf16.gmra.mxu0 %v3669_v29 }
 0x18d   : > { %v1785_v59 = vadd.f32 %v1784_v31, %v1736_v53  ;;  %v1689_v28 = vpop.f32.mrf.mxu1 }
 0x18e   : > { %1879 = vmatmul.bf16.gmra.mxu1 %v3684_v5  ;;  %1928 = vmatmul.bf16.gmra.mxu2 %v3725_v2  ;;  %v1690_v45 = vadd.f32 %v1689_v28, %v1641_v44 }
 0x18f   : > { %2018 = vst [vmem:[%s4183_s13 + $0x50] sm:$0xff] %v1785_v59 }
 0x191   : > { %1977 = vmatmul.bf16.gmra.mxu3 %v3731_v6 }
 0x192   : > { %v1642_v35 = vpop.f32.mrf.mxu0 }
 0x193   : > { %v1643_v5 = vadd.f32 %v1642_v35, %v4159_v54 }
 0x195   : > { %v1691_v11 = vpop.f32.mrf.mxu1 }
 0x196   : > { %v1692_v6 = vadd.f32 %v1691_v11, %v1643_v5 }
 0x19a   : > { %v1738_v29 = vpop.f32.mrf.mxu2 }
 0x19b   : > { %v1739_v58 = vadd.f32 %v1738_v29, %v1690_v45 }
 0x19c   : > { %1835 = vmatmul.bf16.gmra.mxu0 %v3773_v23 }
 0x19e   : > { %1884 = vmatmul.bf16.gmra.mxu1 %v3790_v37  ;;  %1933 = vmatmul.bf16.gmra.mxu2 %v3829_v49  ;;  %v1787_v2 = vpop.f32.mrf.mxu3 }
 0x19f   : > { %v1788_v18 = vadd.f32 %v1787_v2, %v1739_v58 }
 0x1a0   : > { %v1645_v26 = vpop.f32.mrf.mxu0 }
 0x1a1   : > { %1982 = vmatmul.bf16.gmra.mxu3 %v3848_v36  ;;  %2020 = vst [vmem:[%s4183_s13 + $0x60] sm:$0xff] %v1788_v18  ;;  %v1646_v0 = vadd.f32 %v1645_v26, %v4159_v54 }
 0x1a2   : > { %v1740_v39 = vpop.f32.mrf.mxu2 }
 0x1a3   : > { %v1694_v32 = vpop.f32.mrf.mxu1  ;;  %v1741_v27 = vadd.f32 %v1740_v39, %v1692_v6 }
 0x1a4   : > { %v1695_v3 = vadd.f32 %v1694_v32, %v1646_v0 }
 0x1a6   : > { %v1789_v23 = vpop.f32.mrf.mxu3 }
 0x1a7   : > { %v1790_v62 = vadd.f32 %v1789_v23, %v1741_v27 }
 0x1a8   : > { %v1647_v37 = vpop.f32.mrf.mxu0 }
 0x1a9   : > { %2022 = vst [vmem:[%s4183_s13 + $0x70] sm:$0xff] %v1790_v62  ;;  %v1648_v22 = vadd.f32 %v1647_v37, %v4159_v54 }
 0x1ab   : > { %v1696_v49 = vpop.f32.mrf.mxu1 }
 0x1ac   : > { %1840 = vmatmul.bf16.gmra.mxu0 %v3884_v16  ;;  %v1743_v21 = vpop.f32.mrf.mxu2  ;;  %v1697_v12 = vadd.f32 %v1696_v49, %v1648_v22 }
 0x1ad   : > { %v1744_v36 = vadd.f32 %v1743_v21, %v1695_v3 }
 0x1ae   : > { %1889 = vmatmul.bf16.gmra.mxu1 %v3899_v40  ;;  %1938 = vmatmul.bf16.gmra.mxu2 %v3919_v55  ;;  %v4304_v40 = vld [vmem:[#allocation8_spill] sm:$0xff] }
 0x1b0   : > { %v1792_v61 = vpop.f32.mrf.mxu3 }
 0x1b1   : > { %1987 = vmatmul.bf16.gmra.mxu3 %v3946_v57  ;;  %v1793_v4 = vadd.f32 %v1792_v61, %v1744_v36 }
 0x1b3   : > { %2024 = vst [vmem:[%s4183_s13 + $0x80] sm:$0xff] %v1793_v4 }
 0x1b4   : > { %v1745_v38 = vpop.f32.mrf.mxu2 }
 0x1b5   : > { %v1650_v15 = vpop.f32.mrf.mxu0  ;;  %v1746_v56 = vadd.f32 %v1745_v38, %v1697_v12 }
 0x1b6   : > { %v1651_v55 = vadd.f32 %v1650_v15, %v4159_v54 }
 0x1b7   : > { %v1699_v16 = vpop.f32.mrf.mxu1 }
 0x1b8   : > { %v1794_v25 = vpop.f32.mrf.mxu3  ;;  %v1700_v57 = vadd.f32 %v1699_v16, %v1651_v55 }
 0x1b9   : > { %v1795_v13 = vadd.f32 %v1794_v25, %v1746_v56 }
 0x1bb   : > { %2026 = vst [vmem:[%s4183_s13 + $0x90] sm:$0xff] %v1795_v13 }
 0x1bc   : > { %1845 = vmatmul.bf16.gmra.mxu0 %v4304_v40 }
 0x1bd   : > { %v1652_v47 = vpop.f32.mrf.mxu0 }
 0x1be   : > { %1894 = vmatmul.bf16.gmra.mxu1 %v4305_v43  ;;  %1943 = vmatmul.bf16.gmra.mxu2 %v4031_v14  ;;  %v1653_v60 = vadd.f32 %v1652_v47, %v4159_v54 }
 0x1bf   : > { %v1701_v51 = vpop.f32.mrf.mxu1 }
 0x1c0   : > { %v1702_v20 = vadd.f32 %v1701_v51, %v1653_v60 }
 0x1c1   : > { %1992 = vmatmul.bf16.gmra.mxu3 %v4045_v8  ;;  %v1748_v10 = vpop.f32.mrf.mxu2 }
 0x1c2   : > { %v1749_v52 = vadd.f32 %v1748_v10, %v1700_v57 }
 0x1c4   : > { %v1797_v30 = vpop.f32.mrf.mxu3 }
 0x1c5   : > { %v1798_v42 = vadd.f32 %v1797_v30, %v1749_v52 }
 0x1c7   : > { %2028 = vst [vmem:[%s4183_s13 + $0xa0] sm:$0xff] %v1798_v42 }
 0x1c9   : > { %v1655_v46 = vpop.f32.mrf.mxu0  ;;  %v1750_v50 = vpop.f32.mrf.mxu2 }
 0x1ca   : > { %v1751_v53 = vadd.f32 %v1750_v50, %v1702_v20  ;;  %v1656_v14 = vadd.f32 %v1655_v46, %v4159_v54 }
 0x1cb   : > { %v1704_v17 = vpop.f32.mrf.mxu1 }
 0x1cc   : > { %1850 = vmatmul.bf16.gmra.mxu0 %v4110_v9  ;;  %v1799_v7 = vpop.f32.mrf.mxu3  ;;  %v1705_v31 = vadd.f32 %v1704_v17, %v1656_v14 }
 0x1cd   : > { %v1800_v8 = vadd.f32 %v1799_v7, %v1751_v53 }
 0x1ce   : > { %1899 = vmatmul.bf16.gmra.mxu1 %v4122_v48  ;;  %1948 = vmatmul.bf16.gmra.mxu2 %v4124_v34 }
 0x1cf   : > { %2030 = vst [vmem:[%s4183_s13 + $0xb0] sm:$0xff] %v1800_v8 }
 0x1d1   : > { %v1657_v59 = vpop.f32.mrf.mxu0  ;;  %1997 = vmatmul.bf16.gmra.mxu3 %v4148_v1  ;;  %v1753_v28 = vpop.f32.mrf.mxu2 }
 0x1d2   : > { %v1754_v35 = vadd.f32 %v1753_v28, %v1705_v31  ;;  %v1658_v9 = vadd.f32 %v1657_v59, %v4159_v54 }
 0x1d3   : > { %v1706_v44 = vpop.f32.mrf.mxu1 }
 0x1d4   : > { %v1802_v11 = vpop.f32.mrf.mxu3  ;;  %v1707_v29 = vadd.f32 %v1706_v44, %v1658_v9 }
 0x1d5   : > { %v1803_v45 = vadd.f32 %v1802_v11, %v1754_v35 }
 0x1d7   : > { %2032 = vst [vmem:[%s4183_s13 + $0xc0] sm:$0xff] %v1803_v45 }
 0x1d9   : > { %v1660_v58 = vpop.f32.mrf.mxu0  ;;  %v1755_v48 = vpop.f32.mrf.mxu2 }
 0x1da   : > { %v1756_v2 = vadd.f32 %v1755_v48, %v1707_v29  ;;  %v1661_v34 = vadd.f32 %v1660_v58, %v4159_v54 }
 0x1db   : > { %v1709_v5 = vpop.f32.mrf.mxu1 }
 0x1dc   : > { %1855 = vmatmul.bf16.gmra.mxu0 %v4172_v41  ;;  %v1804_v1 = vpop.f32.mrf.mxu3  ;;  %v1710_v26 = vadd.f32 %v1709_v5, %v1661_v34 }
 0x1dd   : > { %v1805_v18 = vadd.f32 %v1804_v1, %v1756_v2 }
 0x1de   : > { %1904 = vmatmul.bf16.gmra.mxu1 %v4176_v24  ;;  %1953 = vmatmul.bf16.gmra.mxu2 %v4178_v19  ;;  %v4254_v24 = vperm.slane %v4150_v63, 1 }
 0x1df   : > { %2034 = vst [vmem:[%s4183_s13 + $0xd0] sm:$0xff] %v1805_v18 }
 0x1e1   : > { %v1662_v6 = vpop.f32.mrf.mxu0  ;;  %2002 = vmatmul.bf16.gmra.mxu3 %v4188_v33  ;;  %v1758_v32 = vpop.f32.mrf.mxu2 }
 0x1e2   : > { %v1759_v27 = vadd.f32 %v1758_v32, %v1710_v26  ;;  %v1663_v41 = vadd.f32 %v1662_v6, %v4159_v54 }
 0x1e3   : > { %v1711_v39 = vpop.f32.mrf.mxu1 }
 0x1e4   : > { %v1807_v23 = vpop.f32.mrf.mxu3  ;;  %v1712_v62 = vadd.f32 %v1711_v39, %v1663_v41 }
 0x1e5   : > { %v1808_v0 = vadd.f32 %v1807_v23, %v1759_v27 }
 0x1e7   : > { %2036 = vst [vmem:[%s4183_s13 + $0xe0] sm:$0xff] %v1808_v0 }
 0x1e9   : > { %v1821_v37 = vpop.f32.mrf.mxu0  ;;  %v1760_v19 = vpop.f32.mrf.mxu2 }
 0x1ea   : > { %v1761_v49 = vadd.f32 %v1760_v19, %v1712_v62  ;;  %v1822_v33 = vadd.f32 %v1821_v37, %v4254_v24 }
 0x1eb   : > { %v1870_v3 = vpop.f32.mrf.mxu1 }
 0x1ec   : > { %v1809_v21 = vpop.f32.mrf.mxu3  ;;  %v1871_v22 = vadd.f32 %v1870_v3, %v1822_v33 }
 0x1ed   : > { %v1810_v36 = vadd.f32 %v1809_v21, %v1761_v49 }
 0x1ef   : > { %2038 = vst [vmem:[%s4183_s13 + $0xf0] sm:$0xff] %v1810_v36 }
 0x1f1   : > { %v1823_v61 = vpop.f32.mrf.mxu0  ;;  %v1919_v54 = vpop.f32.mrf.mxu2 }
 0x1f2   : > { %v1920_v12 = vadd.f32 %v1919_v54, %v1871_v22  ;;  %v1824_v15 = vadd.f32 %v1823_v61, %v4254_v24 }
 0x1f3   : > { %v1872_v4 = vpop.f32.mrf.mxu1 }
 0x1f4   : > { %v1968_v63 = vpop.f32.mrf.mxu3  ;;  %v1873_v56 = vadd.f32 %v1872_v4, %v1824_v15 }
 0x1f5   : > { %v1969_v38 = vadd.f32 %v1968_v63, %v1920_v12 }
 0x1f7   : > { %2009 = vst [vmem:[%s4183_s13 + $0x8] sm:$0xff] %v1969_v38 }
 0x1f9   : > { %v1826_v16 = vpop.f32.mrf.mxu0  ;;  %v1921_v25 = vpop.f32.mrf.mxu2 }
 0x1fa   : > { %v1922_v40 = vadd.f32 %v1921_v25, %v1873_v56  ;;  %v1827_v55 = vadd.f32 %v1826_v16, %v4254_v24 }
 0x1fb   : > { %v1875_v13 = vpop.f32.mrf.mxu1 }
 0x1fc   : > { %v1970_v43 = vpop.f32.mrf.mxu3  ;;  %v1876_v57 = vadd.f32 %v1875_v13, %v1827_v55 }
 0x1fd   : > { %v1971_v47 = vadd.f32 %v1970_v43, %v1922_v40 }
 0x1ff   : > { %2011 = vst [vmem:[%s4183_s13 + $0x18] sm:$0xff] %v1971_v47 }
 0x201   : > { %v1828_v51 = vpop.f32.mrf.mxu0  ;;  %v1924_v10 = vpop.f32.mrf.mxu2 }
 0x202   : > { %v1925_v60 = vadd.f32 %v1924_v10, %v1876_v57  ;;  %v1829_v30 = vadd.f32 %v1828_v51, %v4254_v24 }
 0x203   : > { %v1877_v52 = vpop.f32.mrf.mxu1 }
 0x204   : > { %v1973_v42 = vpop.f32.mrf.mxu3  ;;  %v1878_v46 = vadd.f32 %v1877_v52, %v1829_v30 }
 0x205   : > { %v1974_v20 = vadd.f32 %v1973_v42, %v1925_v60 }
 0x207   : > { %2013 = vst [vmem:[%s4183_s13 + $0x28] sm:$0xff] %v1974_v20 }
 0x209   : > { %v1831_v50 = vpop.f32.mrf.mxu0  ;;  %v1926_v17 = vpop.f32.mrf.mxu2 }
 0x20a   : > { %v1927_v14 = vadd.f32 %v1926_v17, %v1878_v46  ;;  %v1832_v7 = vadd.f32 %v1831_v50, %v4254_v24 }
 0x20b   : > { %v1880_v53 = vpop.f32.mrf.mxu1 }
 0x20c   : > { %v1975_v8 = vpop.f32.mrf.mxu3  ;;  %v1881_v59 = vadd.f32 %v1880_v53, %v1832_v7 }
 0x20d   : > { %v1976_v31 = vadd.f32 %v1975_v8, %v1927_v14 }
 0x20f   : > { %2015 = vst [vmem:[%s4183_s13 + $0x38] sm:$0xff] %v1976_v31 }
 0x211   : > { %v1833_v28 = vpop.f32.mrf.mxu0  ;;  %v1929_v44 = vpop.f32.mrf.mxu2 }
 0x212   : > { %v1930_v9 = vadd.f32 %v1929_v44, %v1881_v59  ;;  %v1834_v11 = vadd.f32 %v1833_v28, %v4254_v24 }
 0x213   : > { %v1882_v35 = vpop.f32.mrf.mxu1 }
 0x214   : > { %v1978_v45 = vpop.f32.mrf.mxu3  ;;  %v1883_v58 = vadd.f32 %v1882_v35, %v1834_v11 }
 0x215   : > { %v1979_v29 = vadd.f32 %v1978_v45, %v1930_v9 }
 0x217   : > { %2017 = vst [vmem:[%s4183_s13 + $0x48] sm:$0xff] %v1979_v29 }
 0x219   : > { %v1836_v48 = vpop.f32.mrf.mxu0  ;;  %v1931_v5 = vpop.f32.mrf.mxu2 }
 0x21a   : > { %v1932_v34 = vadd.f32 %v1931_v5, %v1883_v58  ;;  %v1837_v1 = vadd.f32 %v1836_v48, %v4254_v24 }
 0x21b   : > { %v1885_v2 = vpop.f32.mrf.mxu1 }
 0x21c   : > { %v1980_v18 = vpop.f32.mrf.mxu3  ;;  %v1886_v6 = vadd.f32 %v1885_v2, %v1837_v1 }
 0x21d   : > { %v1981_v26 = vadd.f32 %v1980_v18, %v1932_v34 }
 0x21f   : > { %2019 = vst [vmem:[%s4183_s13 + $0x58] sm:$0xff] %v1981_v26 }
 0x221   : > { %v1838_v32 = vpop.f32.mrf.mxu0  ;;  %v1934_v39 = vpop.f32.mrf.mxu2 }
 0x222   : > { %v1935_v41 = vadd.f32 %v1934_v39, %v1886_v6  ;;  %v1839_v23 = vadd.f32 %v1838_v32, %v4254_v24 }
 0x223   : > { %v1887_v27 = vpop.f32.mrf.mxu1 }
 0x224   : > { %v1983_v0 = vpop.f32.mrf.mxu3  ;;  %v1888_v37 = vadd.f32 %v1887_v27, %v1839_v23 }
 0x225   : > { %v1984_v62 = vadd.f32 %v1983_v0, %v1935_v41 }
 0x227   : > { %2021 = vst [vmem:[%s4183_s13 + $0x68] sm:$0xff] %v1984_v62 }
 0x229   : > { %v1841_v19 = vpop.f32.mrf.mxu0  ;;  %v1936_v3 = vpop.f32.mrf.mxu2 }
 0x22a   : > { %v1937_v33 = vadd.f32 %v1936_v3, %v1888_v37  ;;  %v1842_v21 = vadd.f32 %v1841_v19, %v4254_v24 }
 0x22b   : > { %v1890_v49 = vpop.f32.mrf.mxu1 }
 0x22c   : > { %v1985_v36 = vpop.f32.mrf.mxu3  ;;  %v1891_v61 = vadd.f32 %v1890_v49, %v1842_v21 }
 0x22d   : > { %v1986_v22 = vadd.f32 %v1985_v36, %v1937_v33 }
 0x22f   : > { %2023 = vst [vmem:[%s4183_s13 + $0x78] sm:$0xff] %v1986_v22 }
 0x231   : > { %v1843_v54 = vpop.f32.mrf.mxu0  ;;  %v1939_v4 = vpop.f32.mrf.mxu2 }
 0x232   : > { %v1940_v15 = vadd.f32 %v1939_v4, %v1891_v61  ;;  %v1844_v63 = vadd.f32 %v1843_v54, %v4254_v24 }
 0x233   : > { %v1892_v12 = vpop.f32.mrf.mxu1 }
 0x234   : > { %v1988_v38 = vpop.f32.mrf.mxu3  ;;  %v1893_v16 = vadd.f32 %v1892_v12, %v1844_v63 }
 0x235   : > { %v1989_v56 = vadd.f32 %v1988_v38, %v1940_v15 }
 0x237   : > { %2025 = vst [vmem:[%s4183_s13 + $0x88] sm:$0xff] %v1989_v56 }
 0x239   : > { %v1846_v25 = vpop.f32.mrf.mxu0  ;;  %v1941_v13 = vpop.f32.mrf.mxu2 }
 0x23a   : > { %v1942_v55 = vadd.f32 %v1941_v13, %v1893_v16  ;;  %v1847_v43 = vadd.f32 %v1846_v25, %v4254_v24 }
 0x23b   : > { %v1895_v40 = vpop.f32.mrf.mxu1 }
 0x23c   : > { %v1990_v47 = vpop.f32.mrf.mxu3  ;;  %v1896_v51 = vadd.f32 %v1895_v40, %v1847_v43 }
 0x23d   : > { %v1991_v57 = vadd.f32 %v1990_v47, %v1942_v55 }
 0x23f   : > { %2027 = vst [vmem:[%s4183_s13 + $0x98] sm:$0xff] %v1991_v57 }
 0x241   : > { %v1848_v10 = vpop.f32.mrf.mxu0  ;;  %v1944_v52 = vpop.f32.mrf.mxu2 }
 0x242   : > { %v1945_v30 = vadd.f32 %v1944_v52, %v1896_v51  ;;  %v1849_v42 = vadd.f32 %v1848_v10, %v4254_v24 }
 0x243   : > { %v1897_v60 = vpop.f32.mrf.mxu1 }
 0x244   : > { %v1993_v20 = vpop.f32.mrf.mxu3  ;;  %v1898_v50 = vadd.f32 %v1897_v60, %v1849_v42 }
 0x245   : > { %v1994_v46 = vadd.f32 %v1993_v20, %v1945_v30 }
 0x247   : > { %2029 = vst [vmem:[%s4183_s13 + $0xa8] sm:$0xff] %v1994_v46 }
 0x249   : > { %v1851_v17 = vpop.f32.mrf.mxu0  ;;  %v1946_v53 = vpop.f32.mrf.mxu2 }
 0x24a   : > { %v1947_v7 = vadd.f32 %v1946_v53, %v1898_v50  ;;  %v1852_v8 = vadd.f32 %v1851_v17, %v4254_v24 }
 0x24b   : > { %v1900_v14 = vpop.f32.mrf.mxu1 }
 0x24c   : > { %v1995_v31 = vpop.f32.mrf.mxu3  ;;  %v1901_v28 = vadd.f32 %v1900_v14, %v1852_v8 }
 0x24d   : > { %v1996_v59 = vadd.f32 %v1995_v31, %v1947_v7 }
 0x24f   : > { %2031 = vst [vmem:[%s4183_s13 + $0xb8] sm:$0xff] %v1996_v59 }
 0x251   : > { %v1853_v44 = vpop.f32.mrf.mxu0  ;;  %v1949_v35 = vpop.f32.mrf.mxu2 }
 0x252   : > { %v1950_v9 = vadd.f32 %v1949_v35, %v1901_v28  ;;  %v1854_v45 = vadd.f32 %v1853_v44, %v4254_v24 }
 0x253   : > { %v1902_v11 = vpop.f32.mrf.mxu1 }
 0x254   : > { %v1998_v29 = vpop.f32.mrf.mxu3  ;;  %v1903_v48 = vadd.f32 %v1902_v11, %v1854_v45 }
 0x255   : > { %v1999_v58 = vadd.f32 %v1998_v29, %v1950_v9 }
 0x257   : > { %2033 = vst [vmem:[%s4183_s13 + $0xc8] sm:$0xff] %v1999_v58 }
 0x259   : > { %v1856_v5 = vpop.f32.mrf.mxu0  ;;  %v1951_v2 = vpop.f32.mrf.mxu2 }
 0x25a   : > { %v1952_v34 = vadd.f32 %v1951_v2, %v1903_v48  ;;  %v1857_v1 = vadd.f32 %v1856_v5, %v4254_v24 }
 0x25b   : > { %v1905_v26 = vpop.f32.mrf.mxu1 }
 0x25c   : > { %v2000_v18 = vpop.f32.mrf.mxu3  ;;  %v1906_v32 = vadd.f32 %v1905_v26, %v1857_v1 }
 0x25d   : > { %v2001_v6 = vadd.f32 %v2000_v18, %v1952_v34 }
 0x25f   : > { %2035 = vst [vmem:[%s4183_s13 + $0xd8] sm:$0xff] %v2001_v6 }
 0x261   : > { %v1858_v39 = vpop.f32.mrf.mxu0  ;;  %v1954_v27 = vpop.f32.mrf.mxu2 }
 0x262   : > { %v1955_v41 = vadd.f32 %v1954_v27, %v1906_v32  ;;  %v1859_v23 = vadd.f32 %v1858_v39, %v4254_v24 }
 0x263   : > { %v1907_v37 = vpop.f32.mrf.mxu1 }
 0x264   : > { %v2003_v0 = vpop.f32.mrf.mxu3  ;;  %v1908_v19 = vadd.f32 %v1907_v37, %v1859_v23 }
 0x265   : > { %v2004_v62 = vadd.f32 %v2003_v0, %v1955_v41 }
 0x267   : > { %2037 = vst [vmem:[%s4183_s13 + $0xe8] sm:$0xff] %v2004_v62 }
 0x269   : > { %v1956_v3 = vpop.f32.mrf.mxu2 }
 0x26a   : > { %v1957_v49 = vadd.f32 %v1956_v3, %v1908_v19 }
 0x26c   : > { %v2005_v33 = vpop.f32.mrf.mxu3 }
 0x26d   : > { %v2006_v21 = vadd.f32 %v2005_v33, %v1957_v49 }
 0x26f   : > { %2039 = vst [vmem:[%s4183_s13 + $0xf8] sm:$0xff] %v2006_v21 }
 0x270 PF: > { %s17_s18 = sadd.s32 1, %s2912_s18  }
 0x271   : > { %p14_p7 = scmp.ge.s32.totalorder %s17_s18, 4  }
 0x273   :  { %16 = sbr.rel (!%p14_p7) target bundleno = 2 (0x2), region = 79 }
 0x278   :  { %2064 = vsyncpa [#allocation3], 1 }
 0x279   :  { %2066 = vsyncpa [#allocation3 + $0x1], 1 }
 0x27a   :  { %2067 = vsyncpa [#allocation5], 1 }

</bundles_post_ra>
